<compile_context>
chip_gen: v5e
topology: v5e:2x2
jax: 0.10.0
libtpu: 0.0.40
codegen_flags: <defaults>
</compile_context>

<pallas_src>
import jax
import jax.numpy as jnp
from jax.experimental import pallas as pl
from jax.experimental.pallas import tpu as pltpu

EPS = 1e-5


def _make_kernel(C, H, W, compute_dtype):
    HW = H * W
    PADW = W + 1            # flat halo width; covers shifts up to +/-(W+1)
    inv_hw = 1.0 / HW

    def kernel(x_ref, masks_ref, w1_ref, g1_ref, b1_ref,
               w2_ref, g2_ref, b2_ref, o_ref, pad_ref):
        # x_ref   : (1, C, H*W)            activations, spatial on lanes
        # masks_ref: (2, H*W)              row0: col-1 valid, row1: col+1 valid
        # w*_ref  : (9, C, C)              per-tap (Cout, Cin) conv weights
        # g*/b*_ref: (C, 1)                InstanceNorm affine params (f32)
        # o_ref   : (1, C, H*W)
        # pad_ref : (C, H*W + 2*PADW)      VMEM scratch (compute dtype)

        # Zero ONLY the halo columns; the interior is rewritten before every
        # read.  Not gated on program_id: under "parallel" megacore sharding
        # each core has its own scratch and must see a zero halo.
        pad_ref[:, :PADW] = jnp.zeros((C, PADW), compute_dtype)
        pad_ref[:, PADW + HW:] = jnp.zeros((C, PADW), compute_dtype)

        m_left = masks_ref[0:1, :]      # valid where x-1 >= 0
        m_right = masks_ref[1:2, :]     # valid where x+1 <  W

        def conv3x3(act, w_ref):
            # act: (Cin, HW) compute dtype -> (Cout, HW) f32.
            # 9 accumulated MXU dots on statically shifted views; no
            # materialized im2col, no patch-store traffic.  Row over/underflow
            # reads land in the zero halo; only the horizontal wrap needs the
            # column masks.
            pad_ref[:, PADW:PADW + HW] = act
            acc = None
            t = 0
            for ky in (-1, 0, 1):
                for kx in (-1, 0, 1):
                    start = PADW + ky * W + kx            # static lane offset
                    blk = pad_ref[:, start:start + HW]    # (Cin, HW)
                    if kx == -1:
                        blk = blk * m_left
                    elif kx == 1:
                        blk = blk * m_right
                    d = jnp.dot(w_ref[t], blk,
                                preferred_element_type=jnp.float32)
                    acc = d if acc is None else acc + d
                    t += 1
            return acc                                    # (Cout, HW) f32

        def instance_norm(h, g_ref, b_ref, relu):
            # h: (C, HW) f32.  Fused one-pass moments (lane reductions) and a
            # fused per-channel scale/shift affine.
            mean = jnp.sum(h, axis=-1, keepdims=True) * inv_hw        # (C,1)
            ex2 = jnp.sum(h * h, axis=-1, keepdims=True) * inv_hw     # (C,1)
            var = jnp.maximum(ex2 - mean * mean, 0.0)   # guard f32 cancellation
            scale = g_ref[...] * jax.lax.rsqrt(var + EPS)             # (C,1)
            shift = b_ref[...] - mean * scale                         # (C,1)
            out = h * scale + shift
            if relu:
                out = jnp.maximum(out, 0.0)
            return out

        x_in = x_ref[0]                                  # (C, HW) compute dtype
        h = conv3x3(x_in, w1_ref)
        h = instance_norm(h, g1_ref, b1_ref, relu=True)
        h = conv3x3(h.astype(compute_dtype), w2_ref)
        h = instance_norm(h, g2_ref, b2_ref, relu=False)
        o_ref[0] = (x_in.astype(jnp.float32) + h).astype(o_ref.dtype)

    return kernel


def _invariant_spec(block_shape, index_map):
    """BlockSpec for a grid-invariant operand; single-buffer it when the
    installed JAX supports pipeline_mode=pl.Buffered(1)."""
    buffered = getattr(pl, "Buffered", None)
    if buffered is not None:
        try:
            return pl.BlockSpec(block_shape, index_map,
                                pipeline_mode=buffered(1))
        except TypeError:
            pass
    return pl.BlockSpec(block_shape, index_map)


def residual_block(x_nchw, w1_oihw, gamma1, beta1, w2_oihw, gamma2, beta2,
                   *, compute_dtype=jnp.float32, vmem_limit_bytes=None):
    """x_nchw: (N, C, H, W).  Returns (N, C, H, W) float32.

    compute_dtype: dtype of the MXU operands (activations / conv weights).
    Use jnp.bfloat16 on v6e/v7x for the fast path; statistics, accumulation
    and the residual add stay in float32.
    """
    N, C, H, W = x_nchw.shape
    assert w1_oihw.shape[0] == C, "residual add requires dim_in == dim_out"
    HW = H * W
    PADW = W + 1
    cdt = compute_dtype

    # NCHW with spatial flattened -> (N, C, H*W): pure reshape, no transpose.
    x = x_nchw.reshape(N, C, HW).astype(cdt)

    # Per-tap (Cout, Cin) weight matrices, tap order t = (ky+1)*3 + (kx+1)
    # matching the kernel's loop order.
    w1t = jnp.transpose(w1_oihw, (2, 3, 0, 1)).reshape(9, C, C).astype(cdt)
    w2t = jnp.transpose(w2_oihw, (2, 3, 0, 1)).reshape(9, C, C).astype(cdt)
    g1 = gamma1.reshape(C, 1).astype(jnp.float32)
    b1 = beta1.reshape(C, 1).astype(jnp.float32)
    g2 = gamma2.reshape(C, 1).astype(jnp.float32)
    b2 = beta2.reshape(C, 1).astype(jnp.float32)

    # Column-validity masks for the kx = -1 / +1 taps (exact 0/1 values, so
    # bf16 is lossless).
    col = jnp.arange(HW, dtype=jnp.int32) % W
    masks = jnp.stack([col >= 1, col <= W - 2]).astype(cdt)       # (2, HW)

    kernel = _make_kernel(C, H, W, cdt)

    out = pl.pallas_call(
        kernel,
        out_shape=jax.ShapeDtypeStruct((N, C, HW), jnp.float32),
        grid_spec=pltpu.PrefetchScalarGridSpec(
            num_scalar_prefetch=0,
            grid=(N,),                                   # batch on the grid
            in_specs=[
                pl.BlockSpec((1, C, HW), lambda n: (n, 0, 0)),
                _invariant_spec((2, HW), lambda n: (0, 0)),
                _invariant_spec((9, C, C), lambda n: (0, 0, 0)),
                _invariant_spec((C, 1), lambda n: (0, 0)),
                _invariant_spec((C, 1), lambda n: (0, 0)),
                _invariant_spec((9, C, C), lambda n: (0, 0, 0)),
                _invariant_spec((C, 1), lambda n: (0, 0)),
                _invariant_spec((C, 1), lambda n: (0, 0)),
            ],
            out_specs=pl.BlockSpec((1, C, HW), lambda n: (n, 0, 0)),
            scratch_shapes=[
                pltpu.VMEM((C, HW + 2 * PADW), cdt),     # flat-padded activation
            ],
        ),
        compiler_params=pltpu.CompilerParams(
            dimension_semantics=("parallel",),
            vmem_limit_bytes=vmem_limit_bytes),
    )(x, masks, w1t, g1, b1, w2t, g2, b2)

    # (N, C, H*W) -> (N, C, H, W): contiguous reshape, no transpose.
    return out.reshape(N, C, H, W)


def _reference(x_nchw, w1, g1, b1, w2, g2, b2):
    """Plain-JAX f32 reference for the correctness check."""
    def conv(x, w):
        return jax.lax.conv_general_dilated(
            x, w, window_strides=(1, 1), padding=((1, 1), (1, 1)),
            dimension_numbers=("NCHW", "OIHW", "NCHW"))

    def inorm(x, g, b):
        m = jnp.mean(x, axis=(2, 3), keepdims=True)
        v = jnp.mean((x - m) ** 2, axis=(2, 3), keepdims=True)
        xn = (x - m) * jax.lax.rsqrt(v + EPS)
        return xn * g.reshape(1, -1, 1, 1) + b.reshape(1, -1, 1, 1)

    h = jax.nn.relu(inorm(conv(x_nchw, w1), g1, b1))
    h = inorm(conv(h, w2), g2, b2)
    return x_nchw + h


if __name__ == "__main__":
    # Small shapes consistent with the module: dim_in == dim_out == 4.
    N, C, H, W = 2, 4, 16, 16
    key = jax.random.PRNGKey(0)
    kx_, kw1, kw2, kg1, kb1, kg2, kb2 = jax.random.split(key, 7)

    x = jax.random.normal(kx_, (N, C, H, W), dtype=jnp.float32)
    # Conv2d(dim_in, dim_out, 3) weights, OIHW, bias=False.
    w1 = jax.random.normal(kw1, (C, C, 3, 3), dtype=jnp.float32) * 0.1
    w2 = jax.random.normal(kw2, (C, C, 3, 3), dtype=jnp.float32) * 0.1
    # InstanceNorm2d affine params (defaults are ones/zeros; random values
    # here exercise the affine path).
    gamma1 = 1.0 + 0.1 * jax.random.normal(kg1, (C,), dtype=jnp.float32)
    beta1 = 0.1 * jax.random.normal(kb1, (C,), dtype=jnp.float32)
    gamma2 = 1.0 + 0.1 * jax.random.normal(kg2, (C,), dtype=jnp.float32)
    beta2 = 0.1 * jax.random.normal(kb2, (C,), dtype=jnp.float32)

    ref = jax.block_until_ready(
        _reference(x, w1, gamma1, beta1, w2, gamma2, beta2))

    # Default f32 path: must match the f32 reference tightly.
    out = jax.block_until_ready(
        residual_block(x, w1, gamma1, beta1, w2, gamma2, beta2))
    assert out.shape == (N, C, H, W)
    assert jnp.allclose(out, ref, atol=1e-4, rtol=1e-4), "f32 mismatch vs reference"

    # bf16 MXU-operand path (v6e/v7x fast path); f32 stats/accumulation keep
    # it close to the f32 reference.
    out_bf16 = jax.block_until_ready(
        residual_block(x, w1, gamma1, beta1, w2, gamma2, beta2,
                       compute_dtype=jnp.bfloat16))
    err = float(jnp.max(jnp.abs(out_bf16 - ref)))
    assert err < 0.25, f"bf16 path drifted too far from reference: {err}"

    print("KERNEL_OK")
</pallas_src>

<mosaic_0001>
module attributes {stable_mosaic.version = 11 : i64} {
  func.func @kernel(%arg0: i32, %arg1: memref<1x4x256xf32, #tpu.memory_space<vmem>>, %arg2: memref<2x256xf32, #tpu.memory_space<vmem>>, %arg3: memref<9x4x4xf32, #tpu.memory_space<vmem>>, %arg4: memref<4x1xf32, #tpu.memory_space<vmem>>, %arg5: memref<4x1xf32, #tpu.memory_space<vmem>>, %arg6: memref<9x4x4xf32, #tpu.memory_space<vmem>>, %arg7: memref<4x1xf32, #tpu.memory_space<vmem>>, %arg8: memref<4x1xf32, #tpu.memory_space<vmem>>, %arg9: memref<1x4x256xf32, #tpu.memory_space<vmem>>, %arg10: memref<4x290xf32, #tpu.memory_space<vmem>>) attributes {dimension_semantics = [#tpu.dimension_semantics<parallel>], iteration_bounds = array<i64: 2>, scalar_prefetch = 0 : i64, scratch_operands = 1 : i64, tpu.core_type = #tpu.core_type<tc>, window_params = [{transform_indices = @transform_0, window_bounds = array<i64: 1, 4, 256>}, {pipeline_mode = #tpu.pipeline_mode<synchronous>, transform_indices = @transform_1, window_bounds = array<i64: 2, 256>}, {pipeline_mode = #tpu.pipeline_mode<synchronous>, transform_indices = @transform_2, window_bounds = array<i64: 9, 4, 4>}, {pipeline_mode = #tpu.pipeline_mode<synchronous>, transform_indices = @transform_3, window_bounds = array<i64: 4, 1>}, {pipeline_mode = #tpu.pipeline_mode<synchronous>, transform_indices = @transform_4, window_bounds = array<i64: 4, 1>}, {pipeline_mode = #tpu.pipeline_mode<synchronous>, transform_indices = @transform_5, window_bounds = array<i64: 9, 4, 4>}, {pipeline_mode = #tpu.pipeline_mode<synchronous>, transform_indices = @transform_6, window_bounds = array<i64: 4, 1>}, {pipeline_mode = #tpu.pipeline_mode<synchronous>, transform_indices = @transform_7, window_bounds = array<i64: 4, 1>}, {transform_indices = @transform_8, window_bounds = array<i64: 1, 4, 256>}]} {
    %cst = arith.constant 0.000000e+00 : f32
    %0 = vector.broadcast %cst : f32 to vector<4x17xf32>
    %c0 = arith.constant 0 : index
    %c0_0 = arith.constant 0 : index
    %1 = vector.load %arg10[%c0, %c0_0] : memref<4x290xf32, #tpu.memory_space<vmem>>, vector<4x17xf32>
    tpu.vector_store %arg10[%c0, %c0_0], %0 {strides = array<i32>} : memref<4x290xf32, #tpu.memory_space<vmem>>, vector<4x17xf32>,
    %cst_1 = arith.constant 0.000000e+00 : f32
    %2 = vector.broadcast %cst_1 : f32 to vector<4x17xf32>
    %c0_2 = arith.constant 0 : index
    %c273 = arith.constant 273 : index
    %3 = vector.load %arg10[%c0_2, %c273] : memref<4x290xf32, #tpu.memory_space<vmem>>, vector<4x17xf32>
    tpu.vector_store %arg10[%c0_2, %c273], %2 {strides = array<i32>} : memref<4x290xf32, #tpu.memory_space<vmem>>, vector<4x17xf32>,
    %c0_3 = arith.constant 0 : index
    %c0_4 = arith.constant 0 : index
    %4 = vector.load %arg2[%c0_3, %c0_4] : memref<2x256xf32, #tpu.memory_space<vmem>>, vector<1x256xf32>
    %c1 = arith.constant 1 : index
    %c0_5 = arith.constant 0 : index
    %5 = vector.load %arg2[%c1, %c0_5] : memref<2x256xf32, #tpu.memory_space<vmem>>, vector<1x256xf32>
    %c0_6 = arith.constant 0 : index
    %c0_7 = arith.constant 0 : index
    %c0_8 = arith.constant 0 : index
    %6 = vector.load %arg1[%c0_6, %c0_7, %c0_8] : memref<1x4x256xf32, #tpu.memory_space<vmem>>, vector<1x4x256xf32>
    %7 = vector.shape_cast %6 : vector<1x4x256xf32> to vector<4x256xf32>
    %c0_9 = arith.constant 0 : index
    %c17 = arith.constant 17 : index
    %8 = vector.load %arg10[%c0_9, %c17] : memref<4x290xf32, #tpu.memory_space<vmem>>, vector<4x256xf32>
    tpu.vector_store %arg10[%c0_9, %c17], %7 {strides = array<i32>} : memref<4x290xf32, #tpu.memory_space<vmem>>, vector<4x256xf32>,
    %c0_10 = arith.constant 0 : index
    %c0_11 = arith.constant 0 : index
    %9 = vector.load %arg10[%c0_10, %c0_11] : memref<4x290xf32, #tpu.memory_space<vmem>>, vector<4x256xf32>
    %10 = vector.broadcast %4 : vector<1x256xf32> to vector<4x256xf32>
    %11 = arith.mulf %9, %10 : vector<4x256xf32>
    %c0_12 = arith.constant 0 : index
    %c0_13 = arith.constant 0 : index
    %c0_14 = arith.constant 0 : index
    %12 = vector.load %arg3[%c0_12, %c0_13, %c0_14] : memref<9x4x4xf32, #tpu.memory_space<vmem>>, vector<1x4x4xf32>
    %13 = vector.shape_cast %12 : vector<1x4x4xf32> to vector<4x4xf32>
    %cst_15 = arith.constant dense<0.000000e+00> : vector<4x256xf32>
    %14 = tpu.matmul %13, %11, %cst_15 {dimension_numbers = #tpu.dot_dimension_numbers<[1], [0], [0], [1], [0, 0, 1, 1], [], []>} : vector<4x4xf32>, vector<4x256xf32>, vector<4x256xf32> -> vector<4x256xf32>
    %c0_16 = arith.constant 0 : index
    %c1_17 = arith.constant 1 : index
    %15 = vector.load %arg10[%c0_16, %c1_17] : memref<4x290xf32, #tpu.memory_space<vmem>>, vector<4x256xf32>
    %c1_18 = arith.constant 1 : index
    %c0_19 = arith.constant 0 : index
    %c0_20 = arith.constant 0 : index
    %16 = vector.load %arg3[%c1_18, %c0_19, %c0_20] : memref<9x4x4xf32, #tpu.memory_space<vmem>>, vector<1x4x4xf32>
    %17 = vector.shape_cast %16 : vector<1x4x4xf32> to vector<4x4xf32>
    %cst_21 = arith.constant dense<0.000000e+00> : vector<4x256xf32>
    %18 = tpu.matmul %17, %15, %cst_21 {dimension_numbers = #tpu.dot_dimension_numbers<[1], [0], [0], [1], [0, 0, 1, 1], [], []>} : vector<4x4xf32>, vector<4x256xf32>, vector<4x256xf32> -> vector<4x256xf32>
    %19 = arith.addf %14, %18 : vector<4x256xf32>
    %c0_22 = arith.constant 0 : index
    %c2 = arith.constant 2 : index
    %20 = vector.load %arg10[%c0_22, %c2] : memref<4x290xf32, #tpu.memory_space<vmem>>, vector<4x256xf32>
    %21 = vector.broadcast %5 : vector<1x256xf32> to vector<4x256xf32>
    %22 = arith.mulf %20, %21 : vector<4x256xf32>
    %c2_23 = arith.constant 2 : index
    %c0_24 = arith.constant 0 : index
    %c0_25 = arith.constant 0 : index
    %23 = vector.load %arg3[%c2_23, %c0_24, %c0_25] : memref<9x4x4xf32, #tpu.memory_space<vmem>>, vector<1x4x4xf32>
    %24 = vector.shape_cast %23 : vector<1x4x4xf32> to vector<4x4xf32>
    %cst_26 = arith.constant dense<0.000000e+00> : vector<4x256xf32>
    %25 = tpu.matmul %24, %22, %cst_26 {dimension_numbers = #tpu.dot_dimension_numbers<[1], [0], [0], [1], [0, 0, 1, 1], [], []>} : vector<4x4xf32>, vector<4x256xf32>, vector<4x256xf32> -> vector<4x256xf32>
    %26 = arith.addf %19, %25 : vector<4x256xf32>
    %c0_27 = arith.constant 0 : index
    %c16 = arith.constant 16 : index
    %27 = vector.load %arg10[%c0_27, %c16] : memref<4x290xf32, #tpu.memory_space<vmem>>, vector<4x256xf32>
    %28 = vector.broadcast %4 : vector<1x256xf32> to vector<4x256xf32>
    %29 = arith.mulf %27, %28 : vector<4x256xf32>
    %c3 = arith.constant 3 : index
    %c0_28 = arith.constant 0 : index
    %c0_29 = arith.constant 0 : index
    %30 = vector.load %arg3[%c3, %c0_28, %c0_29] : memref<9x4x4xf32, #tpu.memory_space<vmem>>, vector<1x4x4xf32>
    %31 = vector.shape_cast %30 : vector<1x4x4xf32> to vector<4x4xf32>
    %cst_30 = arith.constant dense<0.000000e+00> : vector<4x256xf32>
    %32 = tpu.matmul %31, %29, %cst_30 {dimension_numbers = #tpu.dot_dimension_numbers<[1], [0], [0], [1], [0, 0, 1, 1], [], []>} : vector<4x4xf32>, vector<4x256xf32>, vector<4x256xf32> -> vector<4x256xf32>
    %33 = arith.addf %26, %32 : vector<4x256xf32>
    %c0_31 = arith.constant 0 : index
    %c17_32 = arith.constant 17 : index
    %34 = vector.load %arg10[%c0_31, %c17_32] : memref<4x290xf32, #tpu.memory_space<vmem>>, vector<4x256xf32>
    %c4 = arith.constant 4 : index
    %c0_33 = arith.constant 0 : index
    %c0_34 = arith.constant 0 : index
    %35 = vector.load %arg3[%c4, %c0_33, %c0_34] : memref<9x4x4xf32, #tpu.memory_space<vmem>>, vector<1x4x4xf32>
    %36 = vector.shape_cast %35 : vector<1x4x4xf32> to vector<4x4xf32>
    %cst_35 = arith.constant dense<0.000000e+00> : vector<4x256xf32>
    %37 = tpu.matmul %36, %34, %cst_35 {dimension_numbers = #tpu.dot_dimension_numbers<[1], [0], [0], [1], [0, 0, 1, 1], [], []>} : vector<4x4xf32>, vector<4x256xf32>, vector<4x256xf32> -> vector<4x256xf32>
    %38 = arith.addf %33, %37 : vector<4x256xf32>
    %c0_36 = arith.constant 0 : index
    %c18 = arith.constant 18 : index
    %39 = vector.load %arg10[%c0_36, %c18] : memref<4x290xf32, #tpu.memory_space<vmem>>, vector<4x256xf32>
    %40 = vector.broadcast %5 : vector<1x256xf32> to vector<4x256xf32>
    %41 = arith.mulf %39, %40 : vector<4x256xf32>
    %c5 = arith.constant 5 : index
    %c0_37 = arith.constant 0 : index
    %c0_38 = arith.constant 0 : index
    %42 = vector.load %arg3[%c5, %c0_37, %c0_38] : memref<9x4x4xf32, #tpu.memory_space<vmem>>, vector<1x4x4xf32>
    %43 = vector.shape_cast %42 : vector<1x4x4xf32> to vector<4x4xf32>
    %cst_39 = arith.constant dense<0.000000e+00> : vector<4x256xf32>
    %44 = tpu.matmul %43, %41, %cst_39 {dimension_numbers = #tpu.dot_dimension_numbers<[1], [0], [0], [1], [0, 0, 1, 1], [], []>} : vector<4x4xf32>, vector<4x256xf32>, vector<4x256xf32> -> vector<4x256xf32>
    %45 = arith.addf %38, %44 : vector<4x256xf32>
    %c0_40 = arith.constant 0 : index
    %c32 = arith.constant 32 : index
    %46 = vector.load %arg10[%c0_40, %c32] : memref<4x290xf32, #tpu.memory_space<vmem>>, vector<4x256xf32>
    %47 = vector.broadcast %4 : vector<1x256xf32> to vector<4x256xf32>
    %48 = arith.mulf %46, %47 : vector<4x256xf32>
    %c6 = arith.constant 6 : index
    %c0_41 = arith.constant 0 : index
    %c0_42 = arith.constant 0 : index
    %49 = vector.load %arg3[%c6, %c0_41, %c0_42] : memref<9x4x4xf32, #tpu.memory_space<vmem>>, vector<1x4x4xf32>
    %50 = vector.shape_cast %49 : vector<1x4x4xf32> to vector<4x4xf32>
    %cst_43 = arith.constant dense<0.000000e+00> : vector<4x256xf32>
    %51 = tpu.matmul %50, %48, %cst_43 {dimension_numbers = #tpu.dot_dimension_numbers<[1], [0], [0], [1], [0, 0, 1, 1], [], []>} : vector<4x4xf32>, vector<4x256xf32>, vector<4x256xf32> -> vector<4x256xf32>
    %52 = arith.addf %45, %51 : vector<4x256xf32>
    %c0_44 = arith.constant 0 : index
    %c33 = arith.constant 33 : index
    %53 = vector.load %arg10[%c0_44, %c33] : memref<4x290xf32, #tpu.memory_space<vmem>>, vector<4x256xf32>
    %c7 = arith.constant 7 : index
    %c0_45 = arith.constant 0 : index
    %c0_46 = arith.constant 0 : index
    %54 = vector.load %arg3[%c7, %c0_45, %c0_46] : memref<9x4x4xf32, #tpu.memory_space<vmem>>, vector<1x4x4xf32>
    %55 = vector.shape_cast %54 : vector<1x4x4xf32> to vector<4x4xf32>
    %cst_47 = arith.constant dense<0.000000e+00> : vector<4x256xf32>
    %56 = tpu.matmul %55, %53, %cst_47 {dimension_numbers = #tpu.dot_dimension_numbers<[1], [0], [0], [1], [0, 0, 1, 1], [], []>} : vector<4x4xf32>, vector<4x256xf32>, vector<4x256xf32> -> vector<4x256xf32>
    %57 = arith.addf %52, %56 : vector<4x256xf32>
    %c0_48 = arith.constant 0 : index
    %c34 = arith.constant 34 : index
    %58 = vector.load %arg10[%c0_48, %c34] : memref<4x290xf32, #tpu.memory_space<vmem>>, vector<4x256xf32>
    %59 = vector.broadcast %5 : vector<1x256xf32> to vector<4x256xf32>
    %60 = arith.mulf %58, %59 : vector<4x256xf32>
    %c8 = arith.constant 8 : index
    %c0_49 = arith.constant 0 : index
    %c0_50 = arith.constant 0 : index
    %61 = vector.load %arg3[%c8, %c0_49, %c0_50] : memref<9x4x4xf32, #tpu.memory_space<vmem>>, vector<1x4x4xf32>
    %62 = vector.shape_cast %61 : vector<1x4x4xf32> to vector<4x4xf32>
    %cst_51 = arith.constant dense<0.000000e+00> : vector<4x256xf32>
    %63 = tpu.matmul %62, %60, %cst_51 {dimension_numbers = #tpu.dot_dimension_numbers<[1], [0], [0], [1], [0, 0, 1, 1], [], []>} : vector<4x4xf32>, vector<4x256xf32>, vector<4x256xf32> -> vector<4x256xf32>
    %64 = arith.addf %57, %63 : vector<4x256xf32>
    %cst_52 = arith.constant dense<0.000000e+00> : vector<4xf32>
    %65 = vector.multi_reduction <add>, %64, %cst_52 [1] : vector<4x256xf32> to vector<4xf32>
    %66 = vector.shape_cast %65 : vector<4xf32> to vector<4x1xf32>
    %cst_53 = arith.constant 3.906250e-03 : f32
    %67 = vector.broadcast %cst_53 : f32 to vector<4x1xf32>
    %68 = arith.mulf %66, %67 : vector<4x1xf32>
    %69 = arith.mulf %64, %64 : vector<4x256xf32>
    %cst_54 = arith.constant dense<0.000000e+00> : vector<4xf32>
    %70 = vector.multi_reduction <add>, %69, %cst_54 [1] : vector<4x256xf32> to vector<4xf32>
    %71 = vector.shape_cast %70 : vector<4xf32> to vector<4x1xf32>
    %cst_55 = arith.constant 3.906250e-03 : f32
    %72 = vector.broadcast %cst_55 : f32 to vector<4x1xf32>
    %73 = arith.mulf %71, %72 : vector<4x1xf32>
    %74 = arith.mulf %68, %68 : vector<4x1xf32>
    %75 = arith.subf %73, %74 : vector<4x1xf32>
    %cst_56 = arith.constant 0.000000e+00 : f32
    %76 = vector.broadcast %cst_56 : f32 to vector<4x1xf32>
    %77 = arith.maximumf %75, %76 : vector<4x1xf32>
    %c0_57 = arith.constant 0 : index
    %c0_58 = arith.constant 0 : index
    %78 = vector.load %arg4[%c0_57, %c0_58] : memref<4x1xf32, #tpu.memory_space<vmem>>, vector<4x1xf32>
    %cst_59 = arith.constant 9.99999974E-6 : f32
    %79 = vector.broadcast %cst_59 : f32 to vector<4x1xf32>
    %80 = arith.addf %77, %79 : vector<4x1xf32>
    %81 = math.rsqrt %80 : vector<4x1xf32>
    %82 = arith.mulf %78, %81 : vector<4x1xf32>
    %c0_60 = arith.constant 0 : index
    %c0_61 = arith.constant 0 : index
    %83 = vector.load %arg5[%c0_60, %c0_61] : memref<4x1xf32, #tpu.memory_space<vmem>>, vector<4x1xf32>
    %84 = arith.mulf %68, %82 : vector<4x1xf32>
    %85 = arith.subf %83, %84 : vector<4x1xf32>
    %86 = vector.broadcast %82 : vector<4x1xf32> to vector<4x256xf32>
    %87 = arith.mulf %64, %86 : vector<4x256xf32>
    %88 = vector.broadcast %85 : vector<4x1xf32> to vector<4x256xf32>
    %89 = arith.addf %87, %88 : vector<4x256xf32>
    %cst_62 = arith.constant 0.000000e+00 : f32
    %90 = vector.broadcast %cst_62 : f32 to vector<4x256xf32>
    %91 = arith.maximumf %89, %90 : vector<4x256xf32>
    %c0_63 = arith.constant 0 : index
    %c17_64 = arith.constant 17 : index
    %92 = vector.load %arg10[%c0_63, %c17_64] : memref<4x290xf32, #tpu.memory_space<vmem>>, vector<4x256xf32>
    tpu.vector_store %arg10[%c0_63, %c17_64], %91 {strides = array<i32>} : memref<4x290xf32, #tpu.memory_space<vmem>>, vector<4x256xf32>,
    %c0_65 = arith.constant 0 : index
    %c0_66 = arith.constant 0 : index
    %93 = vector.load %arg10[%c0_65, %c0_66] : memref<4x290xf32, #tpu.memory_space<vmem>>, vector<4x256xf32>
    %94 = vector.broadcast %4 : vector<1x256xf32> to vector<4x256xf32>
    %95 = arith.mulf %93, %94 : vector<4x256xf32>
    %c0_67 = arith.constant 0 : index
    %c0_68 = arith.constant 0 : index
    %c0_69 = arith.constant 0 : index
    %96 = vector.load %arg6[%c0_67, %c0_68, %c0_69] : memref<9x4x4xf32, #tpu.memory_space<vmem>>, vector<1x4x4xf32>
    %97 = vector.shape_cast %96 : vector<1x4x4xf32> to vector<4x4xf32>
    %cst_70 = arith.constant dense<0.000000e+00> : vector<4x256xf32>
    %98 = tpu.matmul %97, %95, %cst_70 {dimension_numbers = #tpu.dot_dimension_numbers<[1], [0], [0], [1], [0, 0, 1, 1], [], []>} : vector<4x4xf32>, vector<4x256xf32>, vector<4x256xf32> -> vector<4x256xf32>
    %c0_71 = arith.constant 0 : index
    %c1_72 = arith.constant 1 : index
    %99 = vector.load %arg10[%c0_71, %c1_72] : memref<4x290xf32, #tpu.memory_space<vmem>>, vector<4x256xf32>
    %c1_73 = arith.constant 1 : index
    %c0_74 = arith.constant 0 : index
    %c0_75 = arith.constant 0 : index
    %100 = vector.load %arg6[%c1_73, %c0_74, %c0_75] : memref<9x4x4xf32, #tpu.memory_space<vmem>>, vector<1x4x4xf32>
    %101 = vector.shape_cast %100 : vector<1x4x4xf32> to vector<4x4xf32>
    %cst_76 = arith.constant dense<0.000000e+00> : vector<4x256xf32>
    %102 = tpu.matmul %101, %99, %cst_76 {dimension_numbers = #tpu.dot_dimension_numbers<[1], [0], [0], [1], [0, 0, 1, 1], [], []>} : vector<4x4xf32>, vector<4x256xf32>, vector<4x256xf32> -> vector<4x256xf32>
    %103 = arith.addf %98, %102 : vector<4x256xf32>
    %c0_77 = arith.constant 0 : index
    %c2_78 = arith.constant 2 : index
    %104 = vector.load %arg10[%c0_77, %c2_78] : memref<4x290xf32, #tpu.memory_space<vmem>>, vector<4x256xf32>
    %105 = vector.broadcast %5 : vector<1x256xf32> to vector<4x256xf32>
    %106 = arith.mulf %104, %105 : vector<4x256xf32>
    %c2_79 = arith.constant 2 : index
    %c0_80 = arith.constant 0 : index
    %c0_81 = arith.constant 0 : index
    %107 = vector.load %arg6[%c2_79, %c0_80, %c0_81] : memref<9x4x4xf32, #tpu.memory_space<vmem>>, vector<1x4x4xf32>
    %108 = vector.shape_cast %107 : vector<1x4x4xf32> to vector<4x4xf32>
    %cst_82 = arith.constant dense<0.000000e+00> : vector<4x256xf32>
    %109 = tpu.matmul %108, %106, %cst_82 {dimension_numbers = #tpu.dot_dimension_numbers<[1], [0], [0], [1], [0, 0, 1, 1], [], []>} : vector<4x4xf32>, vector<4x256xf32>, vector<4x256xf32> -> vector<4x256xf32>
    %110 = arith.addf %103, %109 : vector<4x256xf32>
    %c0_83 = arith.constant 0 : index
    %c16_84 = arith.constant 16 : index
    %111 = vector.load %arg10[%c0_83, %c16_84] : memref<4x290xf32, #tpu.memory_space<vmem>>, vector<4x256xf32>
    %112 = vector.broadcast %4 : vector<1x256xf32> to vector<4x256xf32>
    %113 = arith.mulf %111, %112 : vector<4x256xf32>
    %c3_85 = arith.constant 3 : index
    %c0_86 = arith.constant 0 : index
    %c0_87 = arith.constant 0 : index
    %114 = vector.load %arg6[%c3_85, %c0_86, %c0_87] : memref<9x4x4xf32, #tpu.memory_space<vmem>>, vector<1x4x4xf32>
    %115 = vector.shape_cast %114 : vector<1x4x4xf32> to vector<4x4xf32>
    %cst_88 = arith.constant dense<0.000000e+00> : vector<4x256xf32>
    %116 = tpu.matmul %115, %113, %cst_88 {dimension_numbers = #tpu.dot_dimension_numbers<[1], [0], [0], [1], [0, 0, 1, 1], [], []>} : vector<4x4xf32>, vector<4x256xf32>, vector<4x256xf32> -> vector<4x256xf32>
    %117 = arith.addf %110, %116 : vector<4x256xf32>
    %c0_89 = arith.constant 0 : index
    %c17_90 = arith.constant 17 : index
    %118 = vector.load %arg10[%c0_89, %c17_90] : memref<4x290xf32, #tpu.memory_space<vmem>>, vector<4x256xf32>
    %c4_91 = arith.constant 4 : index
    %c0_92 = arith.constant 0 : index
    %c0_93 = arith.constant 0 : index
    %119 = vector.load %arg6[%c4_91, %c0_92, %c0_93] : memref<9x4x4xf32, #tpu.memory_space<vmem>>, vector<1x4x4xf32>
    %120 = vector.shape_cast %119 : vector<1x4x4xf32> to vector<4x4xf32>
    %cst_94 = arith.constant dense<0.000000e+00> : vector<4x256xf32>
    %121 = tpu.matmul %120, %118, %cst_94 {dimension_numbers = #tpu.dot_dimension_numbers<[1], [0], [0], [1], [0, 0, 1, 1], [], []>} : vector<4x4xf32>, vector<4x256xf32>, vector<4x256xf32> -> vector<4x256xf32>
    %122 = arith.addf %117, %121 : vector<4x256xf32>
    %c0_95 = arith.constant 0 : index
    %c18_96 = arith.constant 18 : index
    %123 = vector.load %arg10[%c0_95, %c18_96] : memref<4x290xf32, #tpu.memory_space<vmem>>, vector<4x256xf32>
    %124 = vector.broadcast %5 : vector<1x256xf32> to vector<4x256xf32>
    %125 = arith.mulf %123, %124 : vector<4x256xf32>
    %c5_97 = arith.constant 5 : index
    %c0_98 = arith.constant 0 : index
    %c0_99 = arith.constant 0 : index
    %126 = vector.load %arg6[%c5_97, %c0_98, %c0_99] : memref<9x4x4xf32, #tpu.memory_space<vmem>>, vector<1x4x4xf32>
    %127 = vector.shape_cast %126 : vector<1x4x4xf32> to vector<4x4xf32>
    %cst_100 = arith.constant dense<0.000000e+00> : vector<4x256xf32>
    %128 = tpu.matmul %127, %125, %cst_100 {dimension_numbers = #tpu.dot_dimension_numbers<[1], [0], [0], [1], [0, 0, 1, 1], [], []>} : vector<4x4xf32>, vector<4x256xf32>, vector<4x256xf32> -> vector<4x256xf32>
    %129 = arith.addf %122, %128 : vector<4x256xf32>
    %c0_101 = arith.constant 0 : index
    %c32_102 = arith.constant 32 : index
    %130 = vector.load %arg10[%c0_101, %c32_102] : memref<4x290xf32, #tpu.memory_space<vmem>>, vector<4x256xf32>
    %131 = vector.broadcast %4 : vector<1x256xf32> to vector<4x256xf32>
    %132 = arith.mulf %130, %131 : vector<4x256xf32>
    %c6_103 = arith.constant 6 : index
    %c0_104 = arith.constant 0 : index
    %c0_105 = arith.constant 0 : index
    %133 = vector.load %arg6[%c6_103, %c0_104, %c0_105] : memref<9x4x4xf32, #tpu.memory_space<vmem>>, vector<1x4x4xf32>
    %134 = vector.shape_cast %133 : vector<1x4x4xf32> to vector<4x4xf32>
    %cst_106 = arith.constant dense<0.000000e+00> : vector<4x256xf32>
    %135 = tpu.matmul %134, %132, %cst_106 {dimension_numbers = #tpu.dot_dimension_numbers<[1], [0], [0], [1], [0, 0, 1, 1], [], []>} : vector<4x4xf32>, vector<4x256xf32>, vector<4x256xf32> -> vector<4x256xf32>
    %136 = arith.addf %129, %135 : vector<4x256xf32>
    %c0_107 = arith.constant 0 : index
    %c33_108 = arith.constant 33 : index
    %137 = vector.load %arg10[%c0_107, %c33_108] : memref<4x290xf32, #tpu.memory_space<vmem>>, vector<4x256xf32>
    %c7_109 = arith.constant 7 : index
    %c0_110 = arith.constant 0 : index
    %c0_111 = arith.constant 0 : index
    %138 = vector.load %arg6[%c7_109, %c0_110, %c0_111] : memref<9x4x4xf32, #tpu.memory_space<vmem>>, vector<1x4x4xf32>
    %139 = vector.shape_cast %138 : vector<1x4x4xf32> to vector<4x4xf32>
    %cst_112 = arith.constant dense<0.000000e+00> : vector<4x256xf32>
    %140 = tpu.matmul %139, %137, %cst_112 {dimension_numbers = #tpu.dot_dimension_numbers<[1], [0], [0], [1], [0, 0, 1, 1], [], []>} : vector<4x4xf32>, vector<4x256xf32>, vector<4x256xf32> -> vector<4x256xf32>
    %141 = arith.addf %136, %140 : vector<4x256xf32>
    %c0_113 = arith.constant 0 : index
    %c34_114 = arith.constant 34 : index
    %142 = vector.load %arg10[%c0_113, %c34_114] : memref<4x290xf32, #tpu.memory_space<vmem>>, vector<4x256xf32>
    %143 = vector.broadcast %5 : vector<1x256xf32> to vector<4x256xf32>
    %144 = arith.mulf %142, %143 : vector<4x256xf32>
    %c8_115 = arith.constant 8 : index
    %c0_116 = arith.constant 0 : index
    %c0_117 = arith.constant 0 : index
    %145 = vector.load %arg6[%c8_115, %c0_116, %c0_117] : memref<9x4x4xf32, #tpu.memory_space<vmem>>, vector<1x4x4xf32>
    %146 = vector.shape_cast %145 : vector<1x4x4xf32> to vector<4x4xf32>
    %cst_118 = arith.constant dense<0.000000e+00> : vector<4x256xf32>
    %147 = tpu.matmul %146, %144, %cst_118 {dimension_numbers = #tpu.dot_dimension_numbers<[1], [0], [0], [1], [0, 0, 1, 1], [], []>} : vector<4x4xf32>, vector<4x256xf32>, vector<4x256xf32> -> vector<4x256xf32>
    %148 = arith.addf %141, %147 : vector<4x256xf32>
    %cst_119 = arith.constant dense<0.000000e+00> : vector<4xf32>
    %149 = vector.multi_reduction <add>, %148, %cst_119 [1] : vector<4x256xf32> to vector<4xf32>
    %150 = vector.shape_cast %149 : vector<4xf32> to vector<4x1xf32>
    %cst_120 = arith.constant 3.906250e-03 : f32
    %151 = vector.broadcast %cst_120 : f32 to vector<4x1xf32>
    %152 = arith.mulf %150, %151 : vector<4x1xf32>
    %153 = arith.mulf %148, %148 : vector<4x256xf32>
    %cst_121 = arith.constant dense<0.000000e+00> : vector<4xf32>
    %154 = vector.multi_reduction <add>, %153, %cst_121 [1] : vector<4x256xf32> to vector<4xf32>
    %155 = vector.shape_cast %154 : vector<4xf32> to vector<4x1xf32>
    %cst_122 = arith.constant 3.906250e-03 : f32
    %156 = vector.broadcast %cst_122 : f32 to vector<4x1xf32>
    %157 = arith.mulf %155, %156 : vector<4x1xf32>
    %158 = arith.mulf %152, %152 : vector<4x1xf32>
    %159 = arith.subf %157, %158 : vector<4x1xf32>
    %cst_123 = arith.constant 0.000000e+00 : f32
    %160 = vector.broadcast %cst_123 : f32 to vector<4x1xf32>
    %161 = arith.maximumf %159, %160 : vector<4x1xf32>
    %c0_124 = arith.constant 0 : index
    %c0_125 = arith.constant 0 : index
    %162 = vector.load %arg7[%c0_124, %c0_125] : memref<4x1xf32, #tpu.memory_space<vmem>>, vector<4x1xf32>
    %cst_126 = arith.constant 9.99999974E-6 : f32
    %163 = vector.broadcast %cst_126 : f32 to vector<4x1xf32>
    %164 = arith.addf %161, %163 : vector<4x1xf32>
    %165 = math.rsqrt %164 : vector<4x1xf32>
    %166 = arith.mulf %162, %165 : vector<4x1xf32>
    %c0_127 = arith.constant 0 : index
    %c0_128 = arith.constant 0 : index
    %167 = vector.load %arg8[%c0_127, %c0_128] : memref<4x1xf32, #tpu.memory_space<vmem>>, vector<4x1xf32>
    %168 = arith.mulf %152, %166 : vector<4x1xf32>
    %169 = arith.subf %167, %168 : vector<4x1xf32>
    %170 = vector.broadcast %166 : vector<4x1xf32> to vector<4x256xf32>
    %171 = arith.mulf %148, %170 : vector<4x256xf32>
    %172 = vector.broadcast %169 : vector<4x1xf32> to vector<4x256xf32>
    %173 = arith.addf %171, %172 : vector<4x256xf32>
    %174 = arith.addf %7, %173 : vector<4x256xf32>
    %c0_129 = arith.constant 0 : index
    %c0_130 = arith.constant 0 : index
    %c0_131 = arith.constant 0 : index
    %175 = vector.load %arg9[%c0_129, %c0_130, %c0_131] : memref<1x4x256xf32, #tpu.memory_space<vmem>>, vector<1x4x256xf32>
    %176 = vector.shape_cast %175 : vector<1x4x256xf32> to vector<4x256xf32>
    %177 = vector.shape_cast %174 : vector<4x256xf32> to vector<1x4x256xf32>
    tpu.vector_store %arg9[%c0_129, %c0_130, %c0_131], %177 {strides = array<i32>} : memref<1x4x256xf32, #tpu.memory_space<vmem>>, vector<1x4x256xf32>,
    return
  }
  func.func @transform_0(%arg0: i32) -> (i32, i32, i32) {
    %c0_i32 = arith.constant 0 : i32
    %c0_i32_0 = arith.constant 0 : i32
    %c0_i32_1 = arith.constant 0 : i32
    return %arg0, %c0_i32, %c0_i32_0 : i32, i32, i32
  }
  func.func @transform_1(%arg0: i32) -> (i32, i32) {
    %c0_i32 = arith.constant 0 : i32
    %c0_i32_0 = arith.constant 0 : i32
    %c0_i32_1 = arith.constant 0 : i32
    return %c0_i32, %c0_i32_0 : i32, i32
  }
  func.func @transform_2(%arg0: i32) -> (i32, i32, i32) {
    %c0_i32 = arith.constant 0 : i32
    %c0_i32_0 = arith.constant 0 : i32
    %c0_i32_1 = arith.constant 0 : i32
    %c0_i32_2 = arith.constant 0 : i32
    return %c0_i32, %c0_i32_0, %c0_i32_1 : i32, i32, i32
  }
  func.func @transform_3(%arg0: i32) -> (i32, i32) {
    %c0_i32 = arith.constant 0 : i32
    %c0_i32_0 = arith.constant 0 : i32
    %c0_i32_1 = arith.constant 0 : i32
    return %c0_i32, %c0_i32_0 : i32, i32
  }
  func.func @transform_4(%arg0: i32) -> (i32, i32) {
    %c0_i32 = arith.constant 0 : i32
    %c0_i32_0 = arith.constant 0 : i32
    %c0_i32_1 = arith.constant 0 : i32
    return %c0_i32, %c0_i32_0 : i32, i32
  }
  func.func @transform_5(%arg0: i32) -> (i32, i32, i32) {
    %c0_i32 = arith.constant 0 : i32
    %c0_i32_0 = arith.constant 0 : i32
    %c0_i32_1 = arith.constant 0 : i32
    %c0_i32_2 = arith.constant 0 : i32
    return %c0_i32, %c0_i32_0, %c0_i32_1 : i32, i32, i32
  }
  func.func @transform_6(%arg0: i32) -> (i32, i32) {
    %c0_i32 = arith.constant 0 : i32
    %c0_i32_0 = arith.constant 0 : i32
    %c0_i32_1 = arith.constant 0 : i32
    return %c0_i32, %c0_i32_0 : i32, i32
  }
  func.func @transform_7(%arg0: i32) -> (i32, i32) {
    %c0_i32 = arith.constant 0 : i32
    %c0_i32_0 = arith.constant 0 : i32
    %c0_i32_1 = arith.constant 0 : i32
    return %c0_i32, %c0_i32_0 : i32, i32
  }
  func.func @transform_8(%arg0: i32) -> (i32, i32, i32) {
    %c0_i32 = arith.constant 0 : i32
    %c0_i32_0 = arith.constant 0 : i32
    %c0_i32_1 = arith.constant 0 : i32
    return %arg0, %c0_i32, %c0_i32_0 : i32, i32, i32
  }
}

</mosaic_0001>

<bundles_post_ra>
// kernel: tpu_custom_call.1
= control target key start
LH: loop header
LB: loop body
LE: loop exit
PB: predicated region body
PF: predicated region fallthrough
CT: control target
= control target key end

     0   :  { %13 = vsyncpa [#allocation4], 0  ;;  %s2501_s0 = inlined_call_operand.vmem [shape: f32[2,4,256], index: 0, kind: input, shape index: {}]   ;;  %s2502_s1 = inlined_call_operand.vmem [shape: f32[2,256], index: 1, kind: input, shape index: {}]   ;;  %s2503_s2 = inlined_call_operand.vmem [shape: f32[9,4,4], index: 2, kind: input, shape index: {}]   ;;  %s2504_s3 = inlined_call_operand.vmem [shape: f32[4,1], index: 3, kind: input, shape index: {}]   ;;  %s2505_s4 = inlined_call_operand.vmem [shape: f32[4,1], index: 4, kind: input, shape index: {}]   ;;  %s2506_s5 = inlined_call_operand.vmem [shape: f32[9,4,4], index: 5, kind: input, shape index: {}]   ;;  %s2507_s6 = inlined_call_operand.vmem [shape: f32[4,1], index: 6, kind: input, shape index: {}]   ;;  %s2508_s7 = inlined_call_operand.vmem [shape: f32[4,1], index: 7, kind: input, shape index: {}]   ;;  %s2509_s8 = inlined_call_operand.hbm [shape: f32[2,4,256], index: 8, kind: output, shape index: {}]  }
   0x1   :  { %15 = vsyncpa [#allocation4 + $0x1], 0  ;;  %s2088_s27 = smov 0   ;;  %s2090_s28 = smov 0  }
   0x2   :  { %s2092_s29 = smov 0   ;;  %s2094_s30 = smov 0  }
   0x3 LB: > { %s2109_s9 = sadd.s32 4294967295, %s2025_s30   ;;  %s1798_s10 = sadd.s32 4294967294, %s2025_s30   ;;  %s2025_s30 = sphi %s2094_s30, %s2520_s30   ;;  %s2021_s29 = sphi %s2092_s29, %s2519_s29   ;;  %s2017_s28 = sphi %s2090_s28, %s2518_s28   ;;  %s2013_s27 = sphi %s2088_s27, %s2517_s27  }
   0x4   : > { %s2113_s11 = sadd.s32 1, %s2025_s30   ;;  %s201_s12 = sadd.s32 1, %s2021_s29 }
   0x5   : > { %s198_s13 = ssub.s32 %s2025_s30, %s2113_s11  ;;  %p211_p0 = scmp.ne.s32.totalorder %s2021_s29, %s2017_s28 }
   0x6   : > { %p199_p1 = scmp.eq.s32.totalorder %s198_s13, 0  ;;  %p212_p2 = scmp.eq.s32.totalorder %s2109_s9, 1 }
   0x7   : > { %p217_p3 = scmp.ne.s32.totalorder %s2017_s28, %s2013_s27  ;;  %p218_p4 = scmp.eq.s32.totalorder %s1798_s10, 1 }
   0x8   : > { %s2124_s14 = scalar_select %p199_p1, %s2021_s29, %s201_s12  }
   0x9   : > { %p2126_p5 = por %p212_p2, %p211_p0  ;;  %p2130_p6 = por %p218_p4, %p217_p3 }
   0xa   : > { %p1801_p7 = scmp.ge.s32.totalorder %s2025_s30, 1  ;;  %p265_p8 = scmp.lt.s32.totalorder %s2025_s30, 3 }
   0xc   : > { %p266_p9 = pnand %p1801_p7, %p265_p8 }
   0xd   : > { %p299_p10 = scmp.lt.s32.totalorder (!%p266_p9), %s2109_s9, 1  ;;  %s2027_s26 = smov (!%p266_p9), 16  }
   0xe   : > { %269 = sbr.rel (%p266_p9) target bundleno = 1411 (0x583), region = 52  ;;  %s2028_s10 = smov (!%p266_p9), 32  }
   0xf   : > { %s2029_s12 = smov (!%p266_p9), 17   ;;  %s2030_s13 = smov (!%p266_p9), 18  }
  0x10   : > { %s2031_s17 = smov (!%p266_p9), 34   ;;  %s2032_s18 = smov (!%p266_p9), 2  }
  0x11   : > { %s2034_s19 = smov (!%p266_p9), 127   ;;  %s2035_s20 = smov (!%p266_p9), 126  }
  0x12   : > { %s2038_s23 = smov (!%p266_p9), 110   ;;  %s2039_s24 = smov (!%p266_p9), 96  }
  0x13   : > { %v308_v0 = vld [vmem:[%s2502_s1] ss:$2 sm:$0x3]  ;;  %v1805_v3 = vld [vmem:[%s2502_s1 + $0x1] ss:$2 sm:$0x3] }
  0x14   : > { %v327_v1 = vperm.slane %v308_v0, 0  ;;  %v328_v2 = vperm.slane %v308_v0, 1  ;;  %vm330_vm0 = vcmask 1043456   ;;  %s300_s21 = scalar_select %p299_p10, %s2109_s9, 1  ;;  %v458_v5 = vperm.slane %v1805_v3, 1 }
  0x15   : > { %v457_v8 = vperm.slane %v1805_v3, 0  ;;  %vm306_vm1 = vcmask 273544   ;;  %vm304_vm2 = vcmask 134144   ;;  %v2033_v11 = vmov 0.0  }
  0x16   : > { %v329_v4 = vrot.slane %v328_v2, 4  ;;  %s1899_s22 = sshll.u32 %s300_s21, 3  ;;  %v459_v9 = vrot.slane %v458_v5, 4  ;;  %307 = vst.msk [vmem:[#allocation2 + $0x8] sm:$0xf] %vm306_vm1, %v2033_v11  ;;  %vm320_vm3 = vcmask 1043592  }
  0x17   : > { %s2150_s25 = scalar_lea.vmem %s2501_s0, %s1899_s22  ;;  %305 = vst.msk [vmem:[#allocation2] sm:$0xf] %vm304_vm2, %v2033_v11  ;;  %vm321_vm4 = vcmask 1047556   ;;  %vm316_vm5 = vcmask 138240   ;;  %vm464_vm7 = vcmask 15360   ;;  %vm543_vm8 = vcmask 130048  }
  0x18   : > { %v2145_v6 = vsel %vm330_vm0, %v327_v1, %v329_v4  ;;  %v311_v7 = vld [vmem:[%s2150_s25] sm:$0xff]  ;;  %v460_v10 = vsel %vm330_vm0, %v457_v8, %v459_v9  ;;  %vm2158_vm6 = vmor %vm321_vm4, %vm320_vm3  ;;  %s2036_s21 = smov 112   ;;  %vm692_vm9 = vcmask 146432   ;;  %s2037_s22 = smov 111   ;;  %vm771_vm10 = vcmask 261120  }
  0x19   : > { %540 = vrot.lane.b32.xlu1 %v2145_v6, %s2027_s26  ;;  %768 = vrot.lane.b32.xlu2 %v2145_v6, %s2028_s10  ;;  %vm920_vm11 = vcmask 277504   ;;  %s2510_s26 = smov 95   ;;  %s2041_s10 = smov 94   ;;  %vm355_vm12 = vcmask 31744   ;;  %vm352_vm13 = vcmask 1039360   ;;  %vm486_vm14 = vcmask 1031168  }
  0x1a   : > { %313 = vrot.lane.b32.xlu0 %v311_v7, %s2029_s12  ;;  %vm565_vm15 = vcmask 916480   ;;  %vm635_vm1 = vcmask 908288   ;;  %vm714_vm3 = vcmask 900096   ;;  %vm793_vm4 = vcmask 785408  }
  0x21   : > { %689 = vrot.lane.b32.xlu1 %v460_v10, %s2030_s13  ;;  %917 = vrot.lane.b32.xlu2 %v460_v10, %s2031_s17 }
  0x22   : > { %461 = vrot.lane.b32.xlu0 %v460_v10, %s2032_s18 }
  0x73   : > { %v769_v48 = vpop.permute.xlu2 %768 }
  0x74   : > { %v2203_v49 = vrot.slane %v769_v48, 4 }
  0x76   : > { %v2215_v57 = vsel %vm771_vm10, %v2203_v49, %v769_v48  ;;  %v1830_v48 = vld [vmem:[%s2503_s2 + $0x14] sm:$0xf] }
  0x7b   : > { %v918_v62 = vpop.permute.xlu2 %917 }
  0x7c   : > { %v2222_v0 = vrot.slane %v918_v62, 4 }
  0x7e   : > { %v2230_v7 = vsel %vm920_vm11, %v2222_v0, %v918_v62 }
  0x8b   : > { %v541_v26 = vpop.permute.xlu1 %540 }
  0x8c   : > { %v314_v12 = vpop.permute.xlu0 %313  ;;  %v2177_v27 = vrot.slane %v541_v26, 4 }
  0x8d   : > { %v315_v14 = vrot.slane %v314_v12, 4 }
  0x8e   : > { %v2189_v35 = vsel %vm543_vm8, %v2177_v27, %v541_v26  ;;  %vm942_vm8 = vcmask 769024  }
  0x8f   : > { %v317_v15 = vsel %vm316_vm5, %v315_v14, %v314_v12  ;;  %324 = vst.msk [vmem:[#allocation2 + $0x8] sm:$0xf] %vm304_vm2, %v315_v14 }
  0x90   : > { %323 = vst.msk [vmem:[#allocation2] sm:$0xff] %vm2158_vm6, %v317_v15 }
  0x93   : > { %v690_v40 = vpop.permute.xlu1 %689 }
  0x94   : > { %v462_v18 = vpop.permute.xlu0 %461  ;;  %v2196_v42 = vrot.slane %v690_v40, 4 }
  0x95   : > { %v2169_v19 = vrot.slane %v462_v18, 4 }
  0x96   : > { %v335_v17 = vld [vmem:[#allocation2 + $0x8] sm:$0xf]  ;;  %v2206_v50 = vsel %vm692_vm9, %v2196_v42, %v690_v40 }
  0x97   : > { %v2166_v16 = vld [vmem:[#allocation2] sm:$0xff]  ;;  %342 = vst [vmem:[#allocation1 + $0x10] ss:$2 sm:$0xff] %v335_v17  ;;  %v455_v20 = vld [vmem:[#allocation2 + $0x8] sm:$0xf]  ;;  %v2180_v28 = vsel %vm464_vm7, %v2169_v19, %v462_v18  ;;  %vm863_vm7 = vcmask 777216  }
  0x98   : > { %340 = vst [vmem:[#allocation1] ss:$2 sm:$0xff] %v2166_v16  ;;  %v333_v21 = vmul.f32 %v2166_v16, %v2145_v6  ;;  %v469_v24 = vmul.f32 %v2169_v19, %v455_v20  ;;  %v539_v29 = vld [vmem:[#allocation2 + $0x8] sm:$0xf]  ;;  %v468_v30 = vmul.f32 %v2166_v16, %v2180_v28  ;;  %v547_v36 = vmul.f32 %v2189_v35, %v2166_v16  ;;  %v1806_v20 = vld [vmem:[%s2503_s2 + $0x4] sm:$0xf] }
  0x99   : > { %v548_v33 = vmul.f32 %v2177_v27, %v539_v29  ;;  %v618_v37 = vld [vmem:[#allocation2 + $0x8] sm:$0xf]  ;;  %v696_v52 = vmul.f32 %v2206_v50, %v2166_v16  ;;  %v775_v58 = vmul.f32 %v2215_v57, %v2166_v16  ;;  %v924_v8 = vmul.f32 %v2230_v7, %v2166_v16  ;;  %v1815_v29 = vld [vmem:[%s2503_s2 + $0x8] sm:$0xf] }
  0x9a   : > { %v688_v43 = vld [vmem:[#allocation2 + $0x8] sm:$0xf] }
  0x9b   : > { %v697_v44 = vmul.f32 %v2196_v42, %v688_v43  ;;  %v767_v51 = vld [vmem:[#allocation2 + $0x8] sm:$0xf] }
  0x9c   : > { %v776_v53 = vmul.f32 %v2203_v49, %v767_v51  ;;  %v846_v59 = vld [vmem:[#allocation2 + $0x8] sm:$0xf] }
  0x9d   : > { %v916_v1 = vld [vmem:[#allocation2 + $0x8] sm:$0xf] }
  0x9e   : > { %v345_v25 = vld.sshfl [vmem:[#allocation1 + $0x10] sm:$0xff pattern:$0x75316420]  ;;  %v925_v2 = vmul.f32 %v2222_v0, %v916_v1 }
  0x9f   : > { %v343_v22 = vld.sshfl [vmem:[#allocation1] sm:$0xff pattern:$0x75316420]  ;;  %v344_v23 = vld.sshfl [vmem:[#allocation1 + $0x8] sm:$0xff pattern:$0x75316420]  ;;  %350 = vrot.lane.b32.xlu2 %v345_v25, %s2034_s19 }
  0xa0   : > { %404 = vst [vmem:[#allocation1] ss:$2 sm:$0xff] %v333_v21  ;;  %348 = vrot.lane.b32.xlu1 %v344_v23, %s2034_s19  ;;  %346 = vrot.lane.b32.xlu0 %v343_v22, %s2034_s19 }
  0xa1   : > { %476 = vst [vmem:[#allocation1 + $0x10] ss:$2 sm:$0xff] %v469_v24 }
  0xa7   : > { %v405_v31 = vld.sshfl [vmem:[#allocation1] sm:$0xff pattern:$0x75316420]  ;;  %v406_v32 = vld.sshfl [vmem:[#allocation1 + $0x8] sm:$0xff pattern:$0x75316420] }
  0xa8   : > { %474 = vst [vmem:[#allocation1] ss:$2 sm:$0xff] %v468_v30  ;;  %v479_v34 = vld.sshfl [vmem:[#allocation1 + $0x10] sm:$0xff pattern:$0x75316420]  ;;  %1811 = vmatpush.msk.msra.mxu2 %vm330_vm0, %v405_v31  ;;  %1813 = vmatpush.msk.msra.mxu3 %vm330_vm0, %v406_v32 }
  0xa9   : > { %555 = vst [vmem:[#allocation1 + $0x10] ss:$2 sm:$0xff] %v548_v33  ;;  %484 = vrot.lane.b32.xlu2 %v479_v34, %s2035_s20 }
  0xaf   : > { %v477_v38 = vld.sshfl [vmem:[#allocation1] sm:$0xff pattern:$0x75316420]  ;;  %v478_v39 = vld.sshfl [vmem:[#allocation1 + $0x8] sm:$0xff pattern:$0x75316420] }
  0xb0   : > { %553 = vst [vmem:[#allocation1] ss:$2 sm:$0xff] %v547_v36  ;;  %v558_v41 = vld.sshfl [vmem:[#allocation1 + $0x10] sm:$0xff pattern:$0x75316420]  ;;  %482 = vrot.lane.b32.xlu1 %v478_v39, %s2035_s20  ;;  %480 = vrot.lane.b32.xlu0 %v477_v38, %s2035_s20 }
  0xb1   : > { %625 = vst [vmem:[#allocation1 + $0x10] ss:$2 sm:$0xff] %v618_v37  ;;  %563 = vrot.lane.b32.xlu2 %v558_v41, %s2036_s21  ;;  %v1820_v36 = vld [vmem:[%s2503_s2 + $0xc] sm:$0xf]  ;;  %v1825_v41 = vld [vmem:[%s2503_s2 + $0x10] sm:$0xf] }
  0xb7   : > { %v557_v45 = vld.sshfl [vmem:[#allocation1 + $0x8] sm:$0xff pattern:$0x75316420]  ;;  %v556_v46 = vld.sshfl [vmem:[#allocation1] sm:$0xff pattern:$0x75316420] }
  0xb8   : > { %v628_v47 = vld.sshfl [vmem:[#allocation1 + $0x10] sm:$0xff pattern:$0x75316420]  ;;  %561 = vrot.lane.b32.xlu1 %v557_v45, %s2036_s21  ;;  %559 = vrot.lane.b32.xlu0 %v556_v46, %s2036_s21  ;;  %623 = vst [vmem:[#allocation1] ss:$2 sm:$0xff] %v2166_v16 }
  0xb9   : > { %704 = vst [vmem:[#allocation1 + $0x10] ss:$2 sm:$0xff] %v697_v44  ;;  %633 = vrot.lane.b32.xlu2 %v628_v47, %s2037_s22 }
  0xbf   : > { %v627_v54 = vld.sshfl [vmem:[#allocation1 + $0x8] sm:$0xff pattern:$0x75316420]  ;;  %v626_v55 = vld.sshfl [vmem:[#allocation1] sm:$0xff pattern:$0x75316420] }
  0xc0   : > { %v707_v56 = vld.sshfl [vmem:[#allocation1 + $0x10] sm:$0xff pattern:$0x75316420]  ;;  %631 = vrot.lane.b32.xlu1 %v627_v54, %s2037_s22  ;;  %629 = vrot.lane.b32.xlu0 %v626_v55, %s2037_s22  ;;  %702 = vst [vmem:[#allocation1] ss:$2 sm:$0xff] %v696_v52 }
  0xc1   : > { %712 = vrot.lane.b32.xlu2 %v707_v56, %s2038_s23  ;;  %783 = vst [vmem:[#allocation1 + $0x10] ss:$2 sm:$0xff] %v776_v53  ;;  %v1835_v56 = vld [vmem:[%s2503_s2 + $0x18] sm:$0xf] }
  0xc7   : > { %v706_v60 = vld.sshfl [vmem:[#allocation1 + $0x8] sm:$0xff pattern:$0x75316420]  ;;  %v705_v61 = vld.sshfl [vmem:[#allocation1] sm:$0xff pattern:$0x75316420] }
  0xc8   : > { %v786_v63 = vld.sshfl [vmem:[#allocation1 + $0x10] sm:$0xff pattern:$0x75316420]  ;;  %710 = vrot.lane.b32.xlu1 %v706_v60, %s2038_s23  ;;  %708 = vrot.lane.b32.xlu0 %v705_v61, %s2038_s23  ;;  %781 = vst [vmem:[#allocation1] ss:$2 sm:$0xff] %v775_v58 }
  0xc9   : > { %791 = vrot.lane.b32.xlu2 %v786_v63, %s2039_s24  ;;  %853 = vst [vmem:[#allocation1 + $0x10] ss:$2 sm:$0xff] %v846_v59  ;;  %v1840_v63 = vld [vmem:[%s2503_s2 + $0x1c] sm:$0xf] }
  0xcf   : > { %v785_v3 = vld.sshfl [vmem:[#allocation1 + $0x8] sm:$0xff pattern:$0x75316420]  ;;  %v784_v4 = vld.sshfl [vmem:[#allocation1] sm:$0xff pattern:$0x75316420] }
  0xd0   : > { %v856_v5 = vld.sshfl [vmem:[#allocation1 + $0x10] sm:$0xff pattern:$0x75316420]  ;;  %789 = vrot.lane.b32.xlu1 %v785_v3, %s2039_s24  ;;  %787 = vrot.lane.b32.xlu0 %v784_v4, %s2039_s24  ;;  %851 = vst [vmem:[#allocation1] ss:$2 sm:$0xff] %v2166_v16 }
  0xd1   : > { %861 = vrot.lane.b32.xlu2 %v856_v5, %s2510_s26  ;;  %932 = vst [vmem:[#allocation1 + $0x10] ss:$2 sm:$0xff] %v925_v2  ;;  %v334_v16 = vld [vmem:[%s2503_s2] sm:$0xf] }
  0xd2   : > { %1812 = vmatmul.msk.f32.vlgmr.msra.gmra.mxu2 %vm355_vm12, %v334_v16  ;;  %1814 = vmatmul.msk.f32.vlgmr.msra.gmra.mxu3 %vm355_vm12, %v334_v16 }
  0xd7   : > { %v855_v9 = vld.sshfl [vmem:[#allocation1 + $0x8] sm:$0xff pattern:$0x75316420]  ;;  %v854_v10 = vld.sshfl [vmem:[#allocation1] sm:$0xff pattern:$0x75316420] }
  0xd8   : > { %v935_v11 = vld.sshfl [vmem:[#allocation1 + $0x10] sm:$0xff pattern:$0x75316420]  ;;  %859 = vrot.lane.b32.xlu1 %v855_v9, %s2510_s26  ;;  %857 = vrot.lane.b32.xlu0 %v854_v10, %s2510_s26  ;;  %930 = vst [vmem:[#allocation1] ss:$2 sm:$0xff] %v924_v8  ;;  %s296_s26 = sand.u32 1, %s2017_s28  }
  0xd9   : > { %940 = vrot.lane.b32.xlu2 %v935_v11, %s2041_s10  ;;  %v1845_v8 = vld [vmem:[%s2503_s2 + $0x20] sm:$0xf] }
  0xdf   : > { %v934_v12 = vld.sshfl [vmem:[#allocation1 + $0x8] sm:$0xff pattern:$0x75316420]  ;;  %v933_v14 = vld.sshfl [vmem:[#allocation1] sm:$0xff pattern:$0x75316420] }
  0xe0   : > { %938 = vrot.lane.b32.xlu1 %v934_v12, %s2041_s10  ;;  %936 = vrot.lane.b32.xlu0 %v933_v14, %s2041_s10 }
  0xf9   : > { %v351_v15 = vpop.permute.xlu2 %350 }
 0x103   : > { %v485_v23 = vpop.permute.xlu2 %484 }
 0x10b   : > { %v564_v24 = vpop.permute.xlu2 %563 }
 0x112   : > { %v349_v17 = vpop.permute.xlu1 %348  ;;  %v347_v18 = vpop.permute.xlu0 %346 }
 0x113   : > { %v353_v21 = vsel %vm352_vm13, %v347_v18, %v349_v17  ;;  %v354_v22 = vsel %vm352_vm13, %v349_v17, %v351_v15  ;;  %v634_v32 = vpop.permute.xlu2 %633 }
 0x114   : > { %1807 = vmatpush.msk.msra.mxu0 %vm330_vm0, %v353_v21  ;;  %1809 = vmatpush.msk.msra.mxu1 %vm330_vm0, %v354_v22 }
 0x115   : > { %1808 = vmatmul.msk.f32.vlgmr.msra.gmra.mxu0 %vm355_vm12, %v1806_v20  ;;  %1810 = vmatmul.msk.f32.vlgmr.msra.gmra.mxu1 %vm355_vm12, %v1806_v20 }
 0x11b   : > { %v713_v43 = vpop.permute.xlu2 %712 }
 0x122   : > { %v483_v25 = vpop.permute.xlu1 %482  ;;  %v481_v26 = vpop.permute.xlu0 %480 }
 0x123   : > { %v487_v30 = vsel %vm486_vm14, %v481_v26, %v483_v25  ;;  %v488_v31 = vsel %vm486_vm14, %v483_v25, %v485_v23  ;;  %v792_v53 = vpop.permute.xlu2 %791 }
 0x124   : > { %1816 = vmatpush.msk.msrb.mxu0 %vm330_vm0, %v487_v30  ;;  %1818 = vmatpush.msk.msrb.mxu1 %vm330_vm0, %v488_v31 }
 0x125   : > { %1817 = vmatmul.msk.f32.vlgmr.msrb.gmra.mxu0 %vm355_vm12, %v1815_v29  ;;  %1819 = vmatmul.msk.f32.vlgmr.msrb.gmra.mxu1 %vm355_vm12, %v1815_v29 }
 0x12a   : > { %v562_v33 = vpop.permute.xlu1 %561  ;;  %v560_v34 = vpop.permute.xlu0 %559 }
 0x12b   : > { %v566_v37 = vsel %vm565_vm15, %v560_v34, %v562_v33  ;;  %v567_v38 = vsel %vm565_vm15, %v562_v33, %v564_v24  ;;  %v862_v60 = vpop.permute.xlu2 %861 }
 0x12c   : > { %1821 = vmatpush.msk.msrb.mxu2 %vm330_vm0, %v566_v37  ;;  %1823 = vmatpush.msk.msrb.mxu3 %vm330_vm0, %v567_v38 }
 0x12d   : > { %1822 = vmatmul.msk.f32.vlgmr.msrb.gmra.mxu2 %vm355_vm12, %v1820_v36  ;;  %1824 = vmatmul.msk.f32.vlgmr.msrb.gmra.mxu3 %vm355_vm12, %v1820_v36 }
 0x132   : > { %v632_v39 = vpop.permute.xlu1 %631  ;;  %v630_v40 = vpop.permute.xlu0 %629 }
 0x133   : > { %v637_v44 = vsel %vm635_vm1, %v632_v39, %v634_v32  ;;  %v636_v45 = vsel %vm635_vm1, %v630_v40, %v632_v39  ;;  %v941_v3 = vpop.permute.xlu2 %940 }
 0x134   : > { %1826 = vmatpush.msk.msra.mxu0 %vm330_vm0, %v636_v45  ;;  %1828 = vmatpush.msk.msra.mxu1 %vm330_vm0, %v637_v44 }
 0x135   : > { %1827 = vmatmul.msk.f32.vlgmr.msra.gmra.mxu0 %vm355_vm12, %v1825_v41  ;;  %1829 = vmatmul.msk.f32.vlgmr.msra.gmra.mxu1 %vm355_vm12, %v1825_v41 }
 0x13a   : > { %v711_v46 = vpop.permute.xlu1 %710  ;;  %v709_v47 = vpop.permute.xlu0 %708 }
 0x13b   : > { %v716_v51 = vsel %vm714_vm3, %v711_v46, %v713_v43  ;;  %v715_v52 = vsel %vm714_vm3, %v709_v47, %v711_v46 }
 0x13c   : > { %1831 = vmatpush.msk.msra.mxu2 %vm330_vm0, %v715_v52  ;;  %1833 = vmatpush.msk.msra.mxu3 %vm330_vm0, %v716_v51 }
 0x13d   : > { %1832 = vmatmul.msk.f32.vlgmr.msra.gmra.mxu2 %vm355_vm12, %v1830_v48  ;;  %1834 = vmatmul.msk.f32.vlgmr.msra.gmra.mxu3 %vm355_vm12, %v1830_v48 }
 0x142   : > { %v790_v54 = vpop.permute.xlu1 %789  ;;  %v788_v55 = vpop.permute.xlu0 %787 }
 0x143   : > { %v795_v58 = vsel %vm793_vm4, %v790_v54, %v792_v53  ;;  %v794_v59 = vsel %vm793_vm4, %v788_v55, %v790_v54 }
 0x144   : > { %1836 = vmatpush.msk.msrb.mxu0 %vm330_vm0, %v794_v59  ;;  %1838 = vmatpush.msk.msrb.mxu1 %vm330_vm0, %v795_v58 }
 0x145   : > { %1837 = vmatmul.msk.f32.vlgmr.msrb.gmra.mxu0 %vm355_vm12, %v1835_v56  ;;  %1839 = vmatmul.msk.f32.vlgmr.msrb.gmra.mxu1 %vm355_vm12, %v1835_v56 }
 0x14a   : > { %v860_v61 = vpop.permute.xlu1 %859  ;;  %v858_v62 = vpop.permute.xlu0 %857 }
 0x14b   : > { %v865_v1 = vsel %vm863_vm7, %v860_v61, %v862_v60  ;;  %v864_v2 = vsel %vm863_vm7, %v858_v62, %v860_v61  ;;  %v2042_v62 = vmov 0  }
 0x14c   : > { %1841 = vmatpush.msk.msrb.mxu2 %vm330_vm0, %v864_v2  ;;  %1843 = vmatpush.msk.msrb.mxu3 %vm330_vm0, %v865_v1 }
 0x14d   : > { %1842 = vmatmul.msk.f32.vlgmr.msrb.gmra.mxu2 %vm355_vm12, %v1840_v63  ;;  %1844 = vmatmul.msk.f32.vlgmr.msrb.gmra.mxu3 %vm355_vm12, %v1840_v63 }
 0x14e   : > { %1956 = vset.pattern.permute.xlu2 %v2042_v62  ;;  %1957 = vset.pattern.permute.xlu0 %v2042_v62 }
 0x152   : > { %v939_v4 = vpop.permute.xlu1 %938  ;;  %v937_v5 = vpop.permute.xlu0 %936 }
 0x153   : > { %v944_v9 = vsel %vm942_vm8, %v939_v4, %v941_v3  ;;  %v943_v10 = vsel %vm942_vm8, %v937_v5, %v939_v4 }
 0x154   : > { %1846 = vmatpush.msk.msra.mxu0 %vm330_vm0, %v943_v10  ;;  %1848 = vmatpush.msk.msra.mxu1 %vm330_vm0, %v944_v9 }
 0x155   : > { %1847 = vmatmul.msk.f32.vlgmr.msra.gmra.mxu0 %vm355_vm12, %v1845_v8  ;;  %1849 = vmatmul.msk.f32.vlgmr.msra.gmra.mxu1 %vm355_vm12, %v1845_v8  ;;  %v431_v14 = vpop.f32.mrf.mxu2  ;;  %v451_v15 = vpop.f32.mrf.mxu3 }
 0x192   : > { %v380_v11 = vpop.f32.mrf.mxu0  ;;  %v400_v12 = vpop.f32.mrf.mxu1 }
 0x193   : > { %v432_v18 = vadd.f32 %v431_v14, %v380_v11  ;;  %v452_v20 = vadd.f32 %v451_v15, %v400_v12 }
 0x1a2   : > { %v513_v16 = vpop.f32.mrf.mxu0  ;;  %v533_v17 = vpop.f32.mrf.mxu1 }
 0x1a3   : > { %v536_v23 = vadd.f32 %v513_v16, %v432_v18  ;;  %v537_v24 = vadd.f32 %v533_v17, %v452_v20  ;;  %v1011_v16 = vld [vmem:[%s2504_s3] sm:$0xf] }
 0x1b0   : > { %v592_v21 = vpop.f32.mrf.mxu2  ;;  %v612_v22 = vpop.f32.mrf.mxu3 }
 0x1b1   : > { %v615_v29 = vadd.f32 %v592_v21, %v536_v23  ;;  %v616_v30 = vadd.f32 %v612_v22, %v537_v24  ;;  %v1024_v22 = vld [vmem:[%s2505_s4] sm:$0xf] }
 0x1b2   : > { %v662_v25 = vpop.f32.mrf.mxu0  ;;  %v682_v26 = vpop.f32.mrf.mxu1 }
 0x1b3   : > { %v685_v33 = vadd.f32 %v662_v25, %v615_v29  ;;  %v686_v34 = vadd.f32 %v682_v26, %v616_v30 }
 0x1c0   : > { %v741_v31 = vpop.f32.mrf.mxu2  ;;  %v761_v32 = vpop.f32.mrf.mxu3 }
 0x1c1   : > { %v764_v38 = vadd.f32 %v741_v31, %v685_v33  ;;  %v765_v39 = vadd.f32 %v761_v32, %v686_v34 }
 0x1c2   : > { %v820_v36 = vpop.f32.mrf.mxu0  ;;  %v840_v37 = vpop.f32.mrf.mxu1 }
 0x1c3   : > { %v843_v40 = vadd.f32 %v820_v36, %v764_v38  ;;  %v844_v41 = vadd.f32 %v840_v37, %v765_v39 }
 0x1d0   : > { %v890_v43 = vpop.f32.mrf.mxu2  ;;  %v910_v44 = vpop.f32.mrf.mxu3 }
 0x1d1   : > { %v913_v45 = vadd.f32 %v890_v43, %v843_v40  ;;  %v914_v46 = vadd.f32 %v910_v44, %v844_v41 }
 0x1d2   : > { %v969_v47 = vpop.f32.mrf.mxu0  ;;  %v989_v48 = vpop.f32.mrf.mxu1 }
 0x1d3   : > { %v992_v51 = vadd.f32 %v969_v47, %v913_v45  ;;  %v993_v52 = vadd.f32 %v989_v48, %v914_v46 }
 0x1d5   : > { %v994_v53 = vsel %vm330_vm0, %v992_v51, 0.0  ;;  %v995_v54 = vsel %vm330_vm0, %v993_v52, 0.0  ;;  %v1000_v55 = vmul.f32 %v992_v51, %v992_v51  ;;  %v1001_v56 = vmul.f32 %v993_v52, %v993_v52 }
 0x1d6   : > { %v996_v58 = vadd.f32 %v995_v54, %v994_v53 }
 0x1d7   : > { %v1002_v59 = vsel %vm330_vm0, %v1000_v55, 0.0  ;;  %v1003_v60 = vsel %vm330_vm0, %v1001_v56, 0.0 }
 0x1d8   : > { %997 = vadd.xlane.f32.xlu0 %v996_v58  ;;  %v1004_v61 = vadd.f32 %v1003_v60, %v1002_v59 }
 0x1da   : > { %1005 = vadd.xlane.f32.xlu1 %v1004_v61 }
 0x24b   : > { %v998_v63 = vpop.xlane.xlu0 %997 }
 0x24c   : > { %v999_v1 = vmul.f32 0.00390625, %v998_v63 }
 0x24d   : > { %v1006_v2 = vpop.xlane.xlu1 %1005 }
 0x24e   : > { %v1008_v3 = vmul.f32 %v999_v1, %v999_v1  ;;  %v1007_v4 = vmul.f32 0.00390625, %v1006_v2 }
 0x250   : > { %v1009_v5 = vsub.f32 %v1007_v4, %v1008_v3 }
 0x252   : > { %v1010_v8 = vmax.f32 %v1009_v5, 0.0 }
 0x254   : > { %v1012_v9 = vadd.f32 1e-05, %v1010_v8 }
 0x256   : > { %1958 = vrsqrt.f32 %v1012_v9  ;;  %vm1019_vm10 = vweird.f32 %v1012_v9 }
 0x25c   : > { %v1959_v10 = vpop.eup %1958 }
 0x25d   : > { %v1014_v11 = vmul.f32 %v1959_v10, %v1012_v9  ;;  %vm1020_vm9 = vweird.f32 %v1959_v10 }
 0x25e   : > { %vm1021_vm11 = vmor %vm1019_vm10, %vm1020_vm9 }
 0x25f   : > { %v1015_v12 = vmul.f32 %v1959_v10, %v1014_v11 }
 0x261   : > { %v1016_v14 = vmul.f32 0.5, %v1015_v12 }
 0x263   : > { %v1017_v15 = vsub.f32 1.5, %v1016_v14 }
 0x265   : > { %v1018_v17 = vmul.f32 %v1959_v10, %v1017_v15 }
 0x267   : > { %v1022_v18 = vsel %vm1021_vm11, %v1959_v10, %v1018_v17 }
 0x268   : > { %v1023_v20 = vmul.f32 %v1022_v18, %v1011_v16 }
 0x26a   : > { %1029 = vperm.xlu2 %1956, %v1023_v20   ;;  %v1025_v21 = vmul.f32 %v1023_v20, %v999_v1 }
 0x26c   : > { %v1026_v23 = vsub.f32 %v1024_v22, %v1025_v21 }
 0x272   : > { %1036 = vperm.xlu2 %1956, %v1026_v23  }
 0x2c4   : > { %v1030_v24 = vpop.permute.xlu2 %1029 }
 0x2c5   : > { %v1032_v25 = vmul.f32 %v1030_v24, %v992_v51  ;;  %v1033_v26 = vmul.f32 %v1030_v24, %v993_v52  ;;  %v1850_v24 = vld [vmem:[%s2506_s5 + $0x4] sm:$0xf] }
 0x2cc   : > { %v1037_v29 = vpop.permute.xlu2 %1036 }
 0x2cd   : > { %v1039_v30 = vadd.f32 %v1037_v29, %v1032_v25  ;;  %v1040_v31 = vadd.f32 %v1037_v29, %v1033_v26  ;;  %v1057_v26 = vld [vmem:[%s2506_s5] sm:$0xf] }
 0x2cf   : > { %v1042_v32 = vmax.f32 %v1040_v31, 0.0  ;;  %v1041_v33 = vmax.f32 %v1039_v30, 0.0 }
 0x2d1   : > { %v1045_v34 = vrot.slane %v1042_v32, 4  ;;  %v1859_v32 = vld [vmem:[%s2506_s5 + $0x8] sm:$0xf] }
 0x2d3   : > { %v1046_v36 = vsel %vm330_vm0, %v1041_v33, %v1045_v34 }
 0x2d4   : > { %1047 = vrot.lane.b32.xlu2 %v1046_v36, %s2029_s12  ;;  %s2516_s12 = smov 95  }
 0x32e   : > { %v1048_v37 = vpop.permute.xlu2 %1047 }
 0x32f   : > { %v1049_v38 = vrot.slane %v1048_v37, 4 }
 0x331   : > { %v1050_v39 = vsel %vm316_vm5, %v1049_v38, %v1048_v37  ;;  %1054 = vst.msk [vmem:[#allocation2 + $0x8] sm:$0xf] %vm304_vm2, %v1049_v38 }
 0x332   : > { %1053 = vst.msk [vmem:[#allocation2] sm:$0xff] %vm2158_vm6, %v1050_v39  ;;  %v1864_v39 = vld [vmem:[%s2506_s5 + $0xc] sm:$0xf] }
 0x338   : > { %v1058_v41 = vld [vmem:[#allocation2 + $0x8] sm:$0xf] }
 0x339   : > { %v2332_v40 = vld [vmem:[#allocation2] sm:$0xff]  ;;  %1065 = vst [vmem:[#allocation1 + $0x10] ss:$2 sm:$0xff] %v1058_v41  ;;  %v1176_v43 = vld [vmem:[#allocation2 + $0x8] sm:$0xf] }
 0x33a   : > { %1063 = vst [vmem:[#allocation1] ss:$2 sm:$0xff] %v2332_v40  ;;  %v1056_v44 = vmul.f32 %v2332_v40, %v2145_v6  ;;  %v1178_v45 = vmul.f32 %v1176_v43, %v2169_v19  ;;  %v1247_v13 = vld [vmem:[#allocation2 + $0x8] sm:$0xf]  ;;  %v1177_v51 = vmul.f32 %v2332_v40, %v2180_v28  ;;  %v1248_v19 = vmul.f32 %v2332_v40, %v2189_v35 }
 0x33b   : > { %v1249_v52 = vmul.f32 %v1247_v13, %v2177_v27  ;;  %v1318_v55 = vld [vmem:[#allocation2 + $0x8] sm:$0xf]  ;;  %v1388_v63 = vmul.f32 %v2332_v40, %v2206_v50  ;;  %v1459_v4 = vmul.f32 %v2332_v40, %v2215_v57  ;;  %v1599_v14 = vmul.f32 %v2332_v40, %v2230_v7 }
 0x33c   : > { %v1387_v28 = vld [vmem:[#allocation2 + $0x8] sm:$0xf] }
 0x33d   : > { %v1389_v59 = vmul.f32 %v1387_v28, %v2196_v42  ;;  %v1458_v62 = vld [vmem:[#allocation2 + $0x8] sm:$0xf] }
 0x33e   : > { %v1460_v1 = vmul.f32 %v1458_v62, %v2203_v49  ;;  %v1529_v5 = vld [vmem:[#allocation2 + $0x8] sm:$0xf] }
 0x33f   : > { %v1598_v50 = vld [vmem:[#allocation2 + $0x8] sm:$0xf] }
 0x340   : > { %v1068_v48 = vld.sshfl [vmem:[#allocation1 + $0x10] sm:$0xff pattern:$0x75316420]  ;;  %v1600_v10 = vmul.f32 %v1598_v50, %v2222_v0 }
 0x341   : > { %v1066_v46 = vld.sshfl [vmem:[#allocation1] sm:$0xff pattern:$0x75316420]  ;;  %v1067_v47 = vld.sshfl [vmem:[#allocation1 + $0x8] sm:$0xff pattern:$0x75316420]  ;;  %1073 = vrot.lane.b32.xlu2 %v1068_v48, %s2034_s19 }
 0x342   : > { %1125 = vst [vmem:[#allocation1] ss:$2 sm:$0xff] %v1056_v44 }
 0x343   : > { %1185 = vst [vmem:[#allocation1 + $0x10] ss:$2 sm:$0xff] %v1178_v45  ;;  %v1869_v45 = vld [vmem:[%s2506_s5 + $0x10] sm:$0xf] }
 0x349   : > { %v1126_v53 = vld.sshfl [vmem:[#allocation1] sm:$0xff pattern:$0x75316420]  ;;  %v1127_v54 = vld.sshfl [vmem:[#allocation1 + $0x8] sm:$0xff pattern:$0x75316420]  ;;  %1069 = vrot.lane.b32.xlu2 %v1066_v46, %s2034_s19 }
 0x34a   : > { %1855 = vmatpush.msk.msrb.mxu0 %vm330_vm0, %v1126_v53  ;;  %1857 = vmatpush.msk.msrb.mxu1 %vm330_vm0, %v1127_v54  ;;  %1183 = vst [vmem:[#allocation1] ss:$2 sm:$0xff] %v1177_v51  ;;  %v1188_v6 = vld.sshfl [vmem:[#allocation1 + $0x10] sm:$0xff pattern:$0x75316420] }
 0x34b   : > { %1256 = vst [vmem:[#allocation1 + $0x10] ss:$2 sm:$0xff] %v1249_v52  ;;  %1856 = vmatmul.msk.f32.vlgmr.msrb.gmra.mxu0 %vm355_vm12, %v1057_v26  ;;  %1858 = vmatmul.msk.f32.vlgmr.msrb.gmra.mxu1 %vm355_vm12, %v1057_v26  ;;  %v1874_v52 = vld [vmem:[%s2506_s5 + $0x14] sm:$0xf] }
 0x351   : > { %v1187_v56 = vld.sshfl [vmem:[#allocation1 + $0x8] sm:$0xff pattern:$0x75316420]  ;;  %v1186_v58 = vld.sshfl [vmem:[#allocation1] sm:$0xff pattern:$0x75316420]  ;;  %1071 = vrot.lane.b32.xlu2 %v1067_v47, %s2034_s19 }
 0x352   : > { %1191 = vrot.lane.b32.xlu1 %v1187_v56, %s2035_s20  ;;  %1189 = vrot.lane.b32.xlu0 %v1186_v58, %s2035_s20  ;;  %1254 = vst [vmem:[#allocation1] ss:$2 sm:$0xff] %v1248_v19  ;;  %v1259_v27 = vld.sshfl [vmem:[#allocation1 + $0x10] sm:$0xff pattern:$0x75316420]  ;;  %s1900_s19 = sshll.u32 %s2109_s9, 3 }
 0x353   : > { %1325 = vst [vmem:[#allocation1 + $0x10] ss:$2 sm:$0xff] %v1318_v55  ;;  %v1879_v56 = vld [vmem:[%s2506_s5 + $0x18] sm:$0xf]  ;;  %s1723_s9 = scalar_lea.sflag [#allocation4], %s296_s26 }
 0x359   : > { %v1258_v60 = vld.sshfl [vmem:[#allocation1 + $0x8] sm:$0xff pattern:$0x75316420]  ;;  %v1257_v61 = vld.sshfl [vmem:[#allocation1] sm:$0xff pattern:$0x75316420]  ;;  %1193 = vrot.lane.b32.xlu2 %v1188_v6, %s2035_s20 }
 0x35a   : > { %1262 = vrot.lane.b32.xlu0 %v1258_v60, %s2036_s21  ;;  %1323 = vst [vmem:[#allocation1] ss:$2 sm:$0xff] %v2332_v40  ;;  %1260 = vrot.lane.b32.xlu1 %v1257_v61, %s2036_s21  ;;  %v1328_v35 = vld.sshfl [vmem:[#allocation1 + $0x10] sm:$0xff pattern:$0x75316420] }
 0x35b   : > { %1396 = vst [vmem:[#allocation1 + $0x10] ss:$2 sm:$0xff] %v1389_v59  ;;  %v1889_v61 = vld [vmem:[%s2506_s5 + $0x20] sm:$0xf] }
 0x361   : > { %v1326_v2 = vld.sshfl [vmem:[#allocation1] sm:$0xff pattern:$0x75316420]  ;;  %v1327_v42 = vld.sshfl [vmem:[#allocation1 + $0x8] sm:$0xff pattern:$0x75316420]  ;;  %1264 = vrot.lane.b32.xlu2 %v1259_v27, %s2036_s21 }
 0x362   : > { %1331 = vrot.lane.b32.xlu0 %v1327_v42, %s2037_s22  ;;  %1394 = vst [vmem:[#allocation1] ss:$2 sm:$0xff] %v1388_v63  ;;  %v1399_v3 = vld.sshfl [vmem:[#allocation1 + $0x10] sm:$0xff pattern:$0x75316420] }
 0x363   : > { %1467 = vst [vmem:[#allocation1 + $0x10] ss:$2 sm:$0xff] %v1460_v1  ;;  %v1884_v42 = vld [vmem:[%s2506_s5 + $0x1c] sm:$0xf] }
 0x369   : > { %v1398_v8 = vld.sshfl [vmem:[#allocation1 + $0x8] sm:$0xff pattern:$0x75316420]  ;;  %v1397_v9 = vld.sshfl [vmem:[#allocation1] sm:$0xff pattern:$0x75316420]  ;;  %1333 = vrot.lane.b32.xlu2 %v1328_v35, %s2037_s22 }
 0x36a   : > { %1402 = vrot.lane.b32.xlu0 %v1398_v8, %s2038_s23  ;;  %1400 = vrot.lane.b32.xlu1 %v1397_v9, %s2038_s23  ;;  %1465 = vst [vmem:[#allocation1] ss:$2 sm:$0xff] %v1459_v4  ;;  %v1470_v49 = vld.sshfl [vmem:[#allocation1 + $0x10] sm:$0xff pattern:$0x75316420] }
 0x36b   : > { %1536 = vst [vmem:[#allocation1 + $0x10] ss:$2 sm:$0xff] %v1529_v5 }
 0x371   : > { %v1469_v11 = vld.sshfl [vmem:[#allocation1 + $0x8] sm:$0xff pattern:$0x75316420]  ;;  %v1468_v12 = vld.sshfl [vmem:[#allocation1] sm:$0xff pattern:$0x75316420]  ;;  %1404 = vrot.lane.b32.xlu2 %v1399_v3, %s2038_s23 }
 0x372   : > { %1473 = vrot.lane.b32.xlu0 %v1469_v11, %s2039_s24  ;;  %1471 = vrot.lane.b32.xlu1 %v1468_v12, %s2039_s24  ;;  %1534 = vst [vmem:[#allocation1] ss:$2 sm:$0xff] %v2332_v40  ;;  %v1539_v57 = vld.sshfl [vmem:[#allocation1 + $0x10] sm:$0xff pattern:$0x75316420] }
 0x373   : > { %1607 = vst [vmem:[#allocation1 + $0x10] ss:$2 sm:$0xff] %v1600_v10 }
 0x379   : > { %v1537_v15 = vld.sshfl [vmem:[#allocation1] sm:$0xff pattern:$0x75316420]  ;;  %v1538_v16 = vld.sshfl [vmem:[#allocation1 + $0x8] sm:$0xff pattern:$0x75316420]  ;;  %1329 = vrot.lane.b32.xlu2 %v1326_v2, %s2037_s22  ;;  %s1734_s22 = scalar_lea.hbm %s2509_s8, %s1900_s19 }
 0x37a   : > { %1605 = vst [vmem:[#allocation1] ss:$2 sm:$0xff] %v1599_v14  ;;  %v1610_v18 = vld.sshfl [vmem:[#allocation1 + $0x10] sm:$0xff pattern:$0x75316420] }
 0x381   : > { %v1609_v0 = vld.sshfl [vmem:[#allocation1 + $0x8] sm:$0xff pattern:$0x75316420]  ;;  %v1608_v17 = vld.sshfl [vmem:[#allocation1] sm:$0xff pattern:$0x75316420]  ;;  %1475 = vrot.lane.b32.xlu2 %v1470_v49, %s2039_s24 }
 0x382   : > { %1613 = vrot.lane.b32.xlu0 %v1609_v0, %s2041_s10  ;;  %1611 = vrot.lane.b32.xlu1 %v1608_v17, %s2041_s10 }
 0x389   : > { %1615 = vrot.lane.b32.xlu2 %v1610_v18, %s2041_s10  ;;  %s1738_s10 = sshll.u32 %s1734_s22, 4  ;;  %s1739_s10 = int_to_ptr.hbm [resolvable:$true] %s1738_s10 }
 0x38a   : > { %1542 = vrot.lane.b32.xlu0 %v1538_v16, %s2516_s12  ;;  %1540 = vrot.lane.b32.xlu1 %v1537_v15, %s2516_s12  ;;  %s1977_s17 = sshra.s32 %s1739_s10, 4  ;;  %s1978_s17 = int_to_ptr.hbm [resolvable:$true] %s1977_s17 }
 0x38b   : > { %s1979_s18 = scalar_lea.hbm %s1978_s17, 8  ;;  %p1984_p0 = scmp.lt.s32.totalorder %s1978_s17, %s2509_s8 }
 0x38c   : > { %p1980_p11 = scmp.ne.s32.totalorder %s1978_s17, %s1979_s18 }
 0x38e   : > { %p1981_p12 = pnand %p1980_p11, %p2126_p5 }
 0x390   : > { %p1982_p13 = pneg %p1981_p12 }
 0x391   : > { %1544 = vrot.lane.b32.xlu2 %v1539_v57, %s2516_s12  ;;  %s1802_s12 = sshll.u32 %s296_s26, 3 }
 0x392   : > { %s298_s23 = scalar_lea.vmem [#allocation3], %s1802_s12  ;;  %s1983_s12 = scalar_lea.hbm %s2509_s8, 16 }
 0x393   : > { %s1736_s24 = sshll.u32 %s298_s23, 4  ;;  %p1985_p1 = scmp.lt.s32.totalorder %s1983_s12, %s1979_s18  ;;  %s1737_s24 = int_to_ptr.vmem [resolvable:$true] %s1736_s24 }
 0x395   : > { %p1986_p2 = por %p1985_p1, %p1984_p0 }
 0x397   : > { %p1987_p3 = pnand %p1986_p2, %p1982_p13 }
 0x39b   : > { %v1074_v7 = vpop.permute.xlu2 %1073 }
 0x3a3   : > { %v1070_v20 = vpop.permute.xlu2 %1069 }
 0x3ab   : > { %v1072_v21 = vpop.permute.xlu2 %1071 }
 0x3ac   : > { %v1075_v22 = vsel %vm352_vm13, %v1070_v20, %v1072_v21  ;;  %v1076_v23 = vsel %vm352_vm13, %v1072_v21, %v1074_v7 }
 0x3ad   : > { %1851 = vmatpush.msk.msra.mxu2 %vm330_vm0, %v1075_v22  ;;  %1853 = vmatpush.msk.msra.mxu3 %vm330_vm0, %v1076_v23 }
 0x3ae   : > { %1852 = vmatmul.msk.f32.vlgmr.msra.gmra.mxu2 %vm355_vm12, %v1850_v24  ;;  %1854 = vmatmul.msk.f32.vlgmr.msra.gmra.mxu3 %vm355_vm12, %v1850_v24 }
 0x3b3   : > { %v1194_v25 = vpop.permute.xlu2 %1193 }
 0x3bb   : > { %v1265_v29 = vpop.permute.xlu2 %1264 }
 0x3c3   : > { %v1334_v33 = vpop.permute.xlu2 %1333 }
 0x3c4   : > { %v1192_v30 = vpop.permute.xlu1 %1191  ;;  %v1190_v31 = vpop.permute.xlu0 %1189 }
 0x3c5   : > { %v1196_v34 = vsel %vm486_vm14, %v1192_v30, %v1194_v25  ;;  %v1195_v36 = vsel %vm486_vm14, %v1190_v31, %v1192_v30 }
 0x3c6   : > { %1860 = vmatpush.msk.msrb.mxu2 %vm330_vm0, %v1195_v36  ;;  %1862 = vmatpush.msk.msrb.mxu3 %vm330_vm0, %v1196_v34 }
 0x3c7   : > { %1861 = vmatmul.msk.f32.vlgmr.msrb.gmra.mxu2 %vm355_vm12, %v1859_v32  ;;  %1863 = vmatmul.msk.f32.vlgmr.msrb.gmra.mxu3 %vm355_vm12, %v1859_v32 }
 0x3c8   : > { %v1152_v50 = vpop.f32.mrf.mxu0  ;;  %v1172_v10 = vpop.f32.mrf.mxu1 }
 0x3cb   : > { %v1405_v40 = vpop.permute.xlu2 %1404 }
 0x3cc   : > { %v1263_v37 = vpop.permute.xlu0 %1262  ;;  %v1261_v38 = vpop.permute.xlu1 %1260 }
 0x3cd   : > { %v1267_v41 = vsel %vm565_vm15, %v1263_v37, %v1265_v29  ;;  %v1266_v43 = vsel %vm565_vm15, %v1261_v38, %v1263_v37 }
 0x3ce   : > { %1865 = vmatpush.msk.msra.mxu0 %vm330_vm0, %v1266_v43  ;;  %1867 = vmatpush.msk.msra.mxu1 %vm330_vm0, %v1267_v41 }
 0x3cf   : > { %1866 = vmatmul.msk.f32.vlgmr.msra.gmra.mxu0 %vm355_vm12, %v1864_v39  ;;  %1868 = vmatmul.msk.f32.vlgmr.msra.gmra.mxu1 %vm355_vm12, %v1864_v39 }
 0x3d3   : > { %v1330_v46 = vpop.permute.xlu2 %1329 }
 0x3d4   : > { %v1332_v44 = vpop.permute.xlu0 %1331 }
 0x3d5   : > { %v1336_v47 = vsel %vm635_vm1, %v1332_v44, %v1334_v33  ;;  %v1335_v48 = vsel %vm635_vm1, %v1330_v46, %v1332_v44 }
 0x3d6   : > { %1872 = vmatpush.msk.msra.mxu3 %vm330_vm0, %v1336_v47  ;;  %1870 = vmatpush.msk.msra.mxu2 %vm330_vm0, %v1335_v48 }
 0x3d7   : > { %1873 = vmatmul.msk.f32.vlgmr.msra.gmra.mxu3 %vm355_vm12, %v1869_v45  ;;  %1871 = vmatmul.msk.f32.vlgmr.msra.gmra.mxu2 %vm355_vm12, %v1869_v45 }
 0x3db   : > { %v1476_v6 = vpop.permute.xlu2 %1475 }
 0x3dc   : > { %v1403_v13 = vpop.permute.xlu0 %1402  ;;  %v1401_v51 = vpop.permute.xlu1 %1400 }
 0x3dd   : > { %v1407_v53 = vsel %vm714_vm3, %v1403_v13, %v1405_v40  ;;  %v1406_v54 = vsel %vm714_vm3, %v1401_v51, %v1403_v13 }
 0x3de   : > { %1875 = vmatpush.msk.msrb.mxu0 %vm330_vm0, %v1406_v54  ;;  %1877 = vmatpush.msk.msrb.mxu1 %vm330_vm0, %v1407_v53 }
 0x3df   : > { %1876 = vmatmul.msk.f32.vlgmr.msrb.gmra.mxu0 %vm355_vm12, %v1874_v52  ;;  %1878 = vmatmul.msk.f32.vlgmr.msrb.gmra.mxu1 %vm355_vm12, %v1874_v52 }
 0x3e3   : > { %v1616_v28 = vpop.permute.xlu2 %1615 }
 0x3e4   : > { %v1474_v19 = vpop.permute.xlu0 %1473  ;;  %v1472_v55 = vpop.permute.xlu1 %1471 }
 0x3e5   : > { %v1478_v58 = vsel %vm793_vm4, %v1474_v19, %v1476_v6  ;;  %v1477_v27 = vsel %vm793_vm4, %v1472_v55, %v1474_v19 }
 0x3e6   : > { %1880 = vmatpush.msk.msrb.mxu2 %vm330_vm0, %v1477_v27  ;;  %1882 = vmatpush.msk.msrb.mxu3 %vm330_vm0, %v1478_v58 }
 0x3e7   : > { %1881 = vmatmul.msk.f32.vlgmr.msrb.gmra.mxu2 %vm355_vm12, %v1879_v56  ;;  %1883 = vmatmul.msk.f32.vlgmr.msrb.gmra.mxu3 %vm355_vm12, %v1879_v56 }
 0x3eb   : > { %v1545_v63 = vpop.permute.xlu2 %1544 }
 0x3f4   : > { %v1614_v59 = vpop.permute.xlu0 %1613  ;;  %v1612_v60 = vpop.permute.xlu1 %1611 }
 0x3f5   : > { %v1618_v35 = vsel %vm942_vm8, %v1614_v59, %v1616_v28  ;;  %v1617_v62 = vsel %vm942_vm8, %v1612_v60, %v1614_v59 }
 0x3f6   : > { %1890 = vmatpush.msk.msra.mxu2 %vm330_vm0, %v1617_v62  ;;  %1892 = vmatpush.msk.msra.mxu3 %vm330_vm0, %v1618_v35 }
 0x3f7   : > { %1891 = vmatmul.msk.f32.vlgmr.msra.gmra.mxu2 %vm355_vm12, %v1889_v61  ;;  %1893 = vmatmul.msk.f32.vlgmr.msra.gmra.mxu3 %vm355_vm12, %v1889_v61  ;;  %v1685_v61 = vld [vmem:[%s2507_s6] sm:$0xf] }
 0x3fc   : > { %v1543_v1 = vpop.permute.xlu0 %1542  ;;  %v1541_v2 = vpop.permute.xlu1 %1540 }
 0x3fd   : > { %v1547_v3 = vsel %vm863_vm7, %v1543_v1, %v1545_v63  ;;  %v1546_v4 = vsel %vm863_vm7, %v1541_v2, %v1543_v1  ;;  %v1698_v2 = vld [vmem:[%s2508_s7] sm:$0xf] }
 0x3fe   : > { %1885 = vmatpush.msk.msra.mxu0 %vm330_vm0, %v1546_v4  ;;  %1887 = vmatpush.msk.msra.mxu1 %vm330_vm0, %v1547_v3 }
 0x3ff   : > { %1886 = vmatmul.msk.f32.vlgmr.msra.gmra.mxu0 %vm355_vm12, %v1884_v42  ;;  %1888 = vmatmul.msk.f32.vlgmr.msra.gmra.mxu1 %vm355_vm12, %v1884_v42 }
 0x431   : > { %v1101_v5 = vpop.f32.mrf.mxu2  ;;  %v1121_v8 = vpop.f32.mrf.mxu3 }
 0x432   : > { %v1153_v11 = vadd.f32 %v1152_v50, %v1101_v5  ;;  %v1173_v12 = vadd.f32 %v1172_v10, %v1121_v8 }
 0x44a   : > { %v1221_v9 = vpop.f32.mrf.mxu2  ;;  %v1241_v49 = vpop.f32.mrf.mxu3 }
 0x44b   : > { %v1244_v0 = vadd.f32 %v1221_v9, %v1153_v11  ;;  %v1245_v17 = vadd.f32 %v1241_v49, %v1173_v12  ;;  %v1962_v11 = vld [vmem:[%s2150_s25] sm:$0xff] }
 0x44c   : > { %v1292_v15 = vpop.f32.mrf.mxu0  ;;  %v1312_v16 = vpop.f32.mrf.mxu1 }
 0x44d   : > { %v1315_v18 = vadd.f32 %v1292_v15, %v1244_v0  ;;  %v1316_v7 = vadd.f32 %v1312_v16, %v1245_v17 }
 0x45a   : > { %v1361_v57 = vpop.f32.mrf.mxu2  ;;  %v1381_v14 = vpop.f32.mrf.mxu3 }
 0x45b   : > { %v1384_v24 = vadd.f32 %v1361_v57, %v1315_v18  ;;  %v1385_v25 = vadd.f32 %v1381_v14, %v1316_v7 }
 0x45c   : > { %v1432_v22 = vpop.f32.mrf.mxu0  ;;  %v1452_v23 = vpop.f32.mrf.mxu1 }
 0x45d   : > { %v1455_v26 = vadd.f32 %v1432_v22, %v1384_v24  ;;  %v1456_v29 = vadd.f32 %v1452_v23, %v1385_v25 }
 0x46a   : > { %v1503_v20 = vpop.f32.mrf.mxu2  ;;  %v1523_v21 = vpop.f32.mrf.mxu3 }
 0x46b   : > { %v1526_v30 = vadd.f32 %v1503_v20, %v1455_v26  ;;  %v1527_v31 = vadd.f32 %v1523_v21, %v1456_v29 }
 0x47a   : > { %v1643_v32 = vpop.f32.mrf.mxu2  ;;  %v1663_v33 = vpop.f32.mrf.mxu3 }
 0x47c   : > { %v1572_v34 = vpop.f32.mrf.mxu0  ;;  %v1592_v36 = vpop.f32.mrf.mxu1 }
 0x47d   : > { %v1595_v37 = vadd.f32 %v1572_v34, %v1526_v30  ;;  %v1596_v38 = vadd.f32 %v1592_v36, %v1527_v31 }
 0x47f   : > { %v1666_v39 = vadd.f32 %v1643_v32, %v1595_v37  ;;  %v1667_v40 = vadd.f32 %v1663_v33, %v1596_v38 }
 0x481   : > { %v1668_v41 = vsel %vm330_vm0, %v1666_v39, 0.0  ;;  %v1669_v43 = vsel %vm330_vm0, %v1667_v40, 0.0  ;;  %v1674_v44 = vmul.f32 %v1666_v39, %v1666_v39  ;;  %v1675_v45 = vmul.f32 %v1667_v40, %v1667_v40 }
 0x482   : > { %v1670_v46 = vadd.f32 %v1669_v43, %v1668_v41 }
 0x483   : > { %v1676_v47 = vsel %vm330_vm0, %v1674_v44, 0.0  ;;  %v1677_v48 = vsel %vm330_vm0, %v1675_v45, 0.0 }
 0x484   : > { %1671 = vadd.xlane.f32.xlu1 %v1670_v46  ;;  %v1678_v13 = vadd.f32 %v1677_v48, %v1676_v47 }
 0x486   : > { %1679 = vadd.xlane.f32.xlu0 %v1678_v13 }
 0x4f7   : > { %v1672_v51 = vpop.xlane.xlu1 %1671 }
 0x4f8   : > { %v1673_v52 = vmul.f32 0.00390625, %v1672_v51 }
 0x4f9   : > { %v1680_v53 = vpop.xlane.xlu0 %1679 }
 0x4fa   : > { %v1682_v54 = vmul.f32 %v1673_v52, %v1673_v52  ;;  %v1681_v6 = vmul.f32 0.00390625, %v1680_v53 }
 0x4fc   : > { %v1683_v19 = vsub.f32 %v1681_v6, %v1682_v54 }
 0x4fe   : > { %v1684_v55 = vmax.f32 %v1683_v19, 0.0 }
 0x500   : > { %v1686_v56 = vadd.f32 1e-05, %v1684_v55 }
 0x502   : > { %1960 = vrsqrt.f32 %v1686_v56  ;;  %vm1693_vm5 = vweird.f32 %v1686_v56 }
 0x508   : > { %v1961_v58 = vpop.eup %1960 }
 0x509   : > { %v1688_v27 = vmul.f32 %v1961_v58, %v1686_v56  ;;  %vm1694_vm2 = vweird.f32 %v1961_v58 }
 0x50a   : > { %vm1695_vm6 = vmor %vm1693_vm5, %vm1694_vm2 }
 0x50b   : > { %v1689_v28 = vmul.f32 %v1961_v58, %v1688_v27 }
 0x50d   : > { %v1690_v59 = vmul.f32 0.5, %v1689_v28 }
 0x50f   : > { %v1691_v60 = vsub.f32 1.5, %v1690_v59 }
 0x511   : > { %v1692_v35 = vmul.f32 %v1961_v58, %v1691_v60 }
 0x513   : > { %v1696_v62 = vsel %vm1695_vm6, %v1961_v58, %v1692_v35 }
 0x514   : > { %v1697_v63 = vmul.f32 %v1696_v62, %v1685_v61 }
 0x516   : > { %1703 = vperm.xlu2 %1956, %v1697_v63   ;;  %v1699_v1 = vmul.f32 %v1697_v63, %v1673_v52 }
 0x518   : > { %v1700_v42 = vsub.f32 %v1698_v2, %v1699_v1 }
 0x51e   : > { %1710 = vperm.xlu2 %1956, %v1700_v42  }
 0x570   : > { %v1704_v3 = vpop.permute.xlu2 %1703 }
 0x571   : > { %v1707_v4 = vmul.f32 %v1704_v3, %v1667_v40  ;;  %v1706_v8 = vmul.f32 %v1704_v3, %v1666_v39 }
 0x578   : > { %v1711_v5 = vpop.permute.xlu2 %1710 }
 0x579   : > { %v1714_v9 = vadd.f32 %v1711_v5, %v1707_v4  ;;  %v1713_v49 = vadd.f32 %v1711_v5, %v1706_v8 }
 0x57b   : > { %v1717_v50 = vrot.slane %v1714_v9, 4 }
 0x57d   : > { %v1718_v10 = vsel %vm330_vm0, %v1713_v49, %v1717_v50 }
 0x57e   : > { %v1720_v12 = vadd.f32 %v1962_v11, %v1718_v10 }
 0x580   : > { %1721 = vst [vmem:[%s298_s23] sm:$0xff] %v1720_v12 }
 0x581   : > { %1990 = shalt.err (!%p1987_p3)
}
 0x582   : > { %1901 = dma.vmem_to_hbm [thread:$0]  (%p2126_p5), %s1737_s24, 128, %s1739_s10, %s1723_s9  }
 0x583 PF: > { %p1907_p4 = scmp.ge.s32.totalorder %s2025_s30, 2  ;;  %s1750_s25 = sand.u32 1, %s2013_s27  }
 0x584   : > { %s1751_s26 = scalar_lea.sflag [#allocation4], %s1750_s25 }
 0x585   : > { %p1904_p7 = pnand %p1907_p4, %p2130_p6 }
 0x587   : > { %p1905_p8 = pneg %p1904_p7 }
 0x589   : > { %2008 = dma.done.wait (%p1905_p8), %s1751_s26, 128  }
 0x58a   : > { %2010 = vsyncadd (%p1905_p8), %s1751_s26, 4294967168  ;;  %p18_p9 = scmp.ge.s32.totalorder %s2113_s11, 4   ;;  %s2517_s27 = smov %s2017_s28 }
 0x58b   : > { %s2518_s28 = smov %s2021_s29  ;;  %s2519_s29 = smov %s2124_s14 }
 0x58c   : > { %s2520_s30 = smov %s2113_s11  ;;  %20 = sbr.rel (!%p18_p9) target bundleno = 3 (0x3), region = 120 }
 0x591   :  { %1757 = vsyncpa [#allocation4], 1 }
 0x592   :  { %1759 = vsyncpa [#allocation4 + $0x1], 1 }

</bundles_post_ra>
